<compile_context>
chip_gen: v7x
topology: tpu7x:2x2x1
jax: 0.10.0
libtpu: 0.0.40
codegen_flags: <defaults>
</compile_context>

<pallas_src>
from functools import partial

import jax
import jax.numpy as jnp
import numpy as np
from jax.experimental import pallas as pl
from jax.experimental.pallas import tpu as pltpu


# ----------------------------- Pallas kernel --------------------------------
def resnet_block_kernel(
    x_ref,                 # (1, L, Cin_p)  f32
    scale_ref, shift_ref,  # (1, 1, Cout_p) f32 each (precomputed MLP halves)
    w1_ref, b1_ref, g1_ref, be1_ref,   # (3*Cin_p, Cout_p), (1, Cout_p) x3
    w2_ref, b2_ref, g2_ref, be2_ref,   # (3*Cout_p, Cout_p), (1, Cout_p) x3
    wr_ref, br_ref,                    # (Cin_p, Cout_p), (1, Cout_p)
    mcg_ref, mgc_ref,                  # (Cout_p, G), (G, Cout_p)  group one-hots
    o_ref,                             # (1, L, Cout_p)
    *, gs, eps, matmul_dtype,
):
    x = x_ref[0]                       # (L, Cin_p)
    L = x.shape[0]
    n = jnp.float32(L * gs)            # elements per group (real channels only)

    # boundary masks, hoisted once and reused by both convolutions
    row = jax.lax.broadcasted_iota(jnp.int32, (L, 1), 0)
    is_first = row == 0
    is_last = row == (L - 1)

    def conv3(h, w_ref, b_ref):
        # Conv1d kernel=3, padding=1: one fused (L, 3C) x (3C, Cout) matmul.
        h_prev = jnp.where(is_first, 0.0, pltpu.roll(h, shift=1, axis=0))       # h[l-1]
        h_next = jnp.where(is_last, 0.0, pltpu.roll(h, shift=L - 1, axis=0))    # h[l+1]
        h_cat = jnp.concatenate([h_prev, h, h_next], axis=-1).astype(matmul_dtype)
        return (jnp.dot(h_cat, w_ref[...], preferred_element_type=jnp.float32)
                + b_ref[...])

    def group_norm(h, g_row, b_row):
        # h: (L, Cout_p).  Per-group biased stats over (L, gs) via one-hot matmuls.
        s1 = jnp.sum(h, axis=0, keepdims=True)           # (1, Cout_p)
        s2 = jnp.sum(h * h, axis=0, keepdims=True)       # (1, Cout_p)
        mean_g = jnp.dot(s1, mcg_ref[...], preferred_element_type=jnp.float32) / n
        ex2_g = jnp.dot(s2, mcg_ref[...], preferred_element_type=jnp.float32) / n
        var_g = ex2_g - mean_g * mean_g
        inv_g = jax.lax.rsqrt(var_g + eps)
        mean = jnp.dot(mean_g, mgc_ref[...], preferred_element_type=jnp.float32)
        inv = jnp.dot(inv_g, mgc_ref[...], preferred_element_type=jnp.float32)
        return (h - mean) * inv * g_row + b_row

    # --- block1: conv -> groupnorm -> scale/shift -> SiLU ---
    h = conv3(x, w1_ref, b1_ref)
    h = group_norm(h, g1_ref[...], be1_ref[...])
    h = h * (scale_ref[0] + 1.0) + shift_ref[0]
    h = h * jax.nn.sigmoid(h)

    # --- block2: conv -> groupnorm -> SiLU ---
    h = conv3(h, w2_ref, b2_ref)
    h = group_norm(h, g2_ref[...], be2_ref[...])
    h = h * jax.nn.sigmoid(h)

    # --- residual 1x1 conv ---
    res = (jnp.dot(x.astype(matmul_dtype), wr_ref[...],
                   preferred_element_type=jnp.float32) + br_ref[...])
    o_ref[0] = h + res


# ------------------------------- Wrapper -------------------------------------
def _round_up(x, m):
    return (x + m - 1) // m * m


def resnet_block_forward(x_ncl, time_emb, class_emb, params, *, groups=8, eps=1e-5,
                         matmul_dtype=jnp.float32):
    B, Cin, L = x_ncl.shape
    Cout = params["w1"].shape[0]
    assert Cout % groups == 0, "groups must divide dim_out"
    gs = Cout // groups

    # pad channel (lane) dims to multiples of 128 for lane-dense MXU / stores
    Cin_p = _round_up(Cin, 128)
    Cout_p = _round_up(Cout, 128)

    # channels-last activations, zero-padded channels
    x = jnp.transpose(x_ncl, (0, 2, 1)).astype(jnp.float32)      # (B, L, Cin)
    x = jnp.pad(x, ((0, 0), (0, 0), (0, Cin_p - Cin)))

    # --- conditioning MLP (SiLU -> Linear -> chunk) done once for all B in XLA ---
    cond = jnp.concatenate([time_emb, class_emb], axis=-1)       # (B, E)
    ce = cond * jax.nn.sigmoid(cond)
    ss = ce @ params["w_mlp"].T + params["b_mlp"]                # (B, 2*Cout)
    scale = jnp.pad(ss[:, :Cout], ((0, 0), (0, Cout_p - Cout)))[:, None, :]   # (B,1,Cout_p)
    shift = jnp.pad(ss[:, Cout:], ((0, 0), (0, Cout_p - Cout)))[:, None, :]   # (B,1,Cout_p)

    # --- convert PyTorch weight layouts; flatten k=3 conv taps into (3*C, Cout) ---
    def flat_conv_w(w, cin_p):                                   # w: (Cout, Cin, 3)
        taps = []
        for k in range(3):
            wk = w[:, :, k].T                                    # (Cin, Cout)
            wk = jnp.pad(wk, ((0, cin_p - wk.shape[0]), (0, Cout_p - Cout)))
            taps.append(wk)
        return jnp.concatenate(taps, axis=0).astype(matmul_dtype)  # (3*cin_p, Cout_p)

    def pad_row(v):                                              # (Cout,) -> (1, Cout_p)
        return jnp.pad(v, (0, Cout_p - Cout))[None].astype(jnp.float32)

    w1 = flat_conv_w(params["w1"], Cin_p)
    w2 = flat_conv_w(params["w2"], Cout_p)
    b1, b2 = pad_row(params["b1"]), pad_row(params["b2"])
    g1, be1 = pad_row(params["gn1_w"]), pad_row(params["gn1_b"])
    g2, be2 = pad_row(params["gn2_w"]), pad_row(params["gn2_b"])
    wr = jnp.pad(params["w_res"][:, :, 0].T,
                 ((0, Cin_p - Cin), (0, Cout_p - Cout))).astype(matmul_dtype)
    br = pad_row(params["b_res"])

    # --- precomputed group one-hot matrices (pad channels map to no group) ---
    ch = np.arange(Cout_p)
    onehot = ((ch[:, None] // gs == np.arange(groups)[None, :])
              & (ch[:, None] < Cout)).astype(np.float32)          # (Cout_p, G)
    mcg = jnp.asarray(onehot)
    mgc = jnp.asarray(onehot.T)                                   # (G, Cout_p)

    def full(arr):
        return pl.BlockSpec(arr.shape, lambda b, nd=arr.ndim: (0,) * nd)

    kernel = partial(resnet_block_kernel, gs=gs, eps=eps, matmul_dtype=matmul_dtype)

    # TODO(synk): for very long L, tile L with a 1-row halo + two-pass GroupNorm to
    # fit v7x's 64 MiB VMEM; for large B with small L, fold several batch rows per
    # grid step to raise matmul M.
    out = pl.pallas_call(
        kernel,
        out_shape=jax.ShapeDtypeStruct((B, L, Cout_p), jnp.float32),
        grid=(B,),
        in_specs=[
            pl.BlockSpec((1, L, Cin_p), lambda b: (b, 0, 0)),
            pl.BlockSpec((1, 1, Cout_p), lambda b: (b, 0, 0)),
            pl.BlockSpec((1, 1, Cout_p), lambda b: (b, 0, 0)),
            full(w1), full(b1), full(g1), full(be1),
            full(w2), full(b2), full(g2), full(be2),
            full(wr), full(br),
            full(mcg), full(mgc),
        ],
        out_specs=pl.BlockSpec((1, L, Cout_p), lambda b: (b, 0, 0)),
        compiler_params=pltpu.CompilerParams(dimension_semantics=("parallel",)),
    )(x, scale, shift, w1, b1, g1, be1, w2, b2, g2, be2, wr, br, mcg, mgc)

    return jnp.transpose(out[:, :, :Cout], (0, 2, 1))            # back to (B, Cout, L)


# --------------------------- Pure-JAX reference -------------------------------
def _silu(x):
    return x * jax.nn.sigmoid(x)


def ref_forward(x, time_emb, class_emb, params, *, groups=8, eps=1e-5):
    B, Cin, L = x.shape
    Cout = params["w1"].shape[0]
    cond = jnp.concatenate([time_emb, class_emb], axis=-1)
    ce = _silu(cond) @ params["w_mlp"].T + params["b_mlp"]
    scale = ce[:, :Cout, None]
    shift = ce[:, Cout:, None]

    def conv1d(h, w, b):
        hp = jnp.pad(h, ((0, 0), (0, 0), (1, 1)))
        y = sum(jnp.einsum("bcl,dc->bdl", hp[:, :, k:k + L], w[:, :, k]) for k in range(3))
        return y + b[None, :, None]

    def gnorm(h, g, b):
        B_, C, L_ = h.shape
        hg = h.reshape(B_, groups, C // groups, L_)
        m = hg.mean(axis=(2, 3), keepdims=True)
        v = ((hg - m) ** 2).mean(axis=(2, 3), keepdims=True)
        hn = ((hg - m) / jnp.sqrt(v + eps)).reshape(B_, C, L_)
        return hn * g[None, :, None] + b[None, :, None]

    h = conv1d(x, params["w1"], params["b1"])
    h = gnorm(h, params["gn1_w"], params["gn1_b"])
    h = h * (scale + 1) + shift
    h = _silu(h)
    h = conv1d(h, params["w2"], params["b2"])
    h = gnorm(h, params["gn2_w"], params["gn2_b"])
    h = _silu(h)
    res = jnp.einsum("bcl,dc->bdl", x, params["w_res"][:, :, 0]) + params["b_res"][None, :, None]
    return h + res


# --------------------------------- Main ---------------------------------------
if __name__ == "__main__":
    B, dim, dim_out, L = 2, 8, 16, 16
    time_emb_dim, classes_emb_dim = 8, 8
    groups = 8
    E = time_emb_dim + classes_emb_dim

    key = jax.random.PRNGKey(0)
    keys = jax.random.split(key, 16)

    def rnd(k, shape, s=0.1):
        return (s * jax.random.normal(k, shape)).astype(jnp.float32)

    params = {
        "w_mlp": rnd(keys[0], (2 * dim_out, E)),
        "b_mlp": rnd(keys[1], (2 * dim_out,)),
        "w1": rnd(keys[2], (dim_out, dim, 3)),
        "b1": rnd(keys[3], (dim_out,)),
        "gn1_w": 1.0 + rnd(keys[4], (dim_out,)),
        "gn1_b": rnd(keys[5], (dim_out,)),
        "w2": rnd(keys[6], (dim_out, dim_out, 3)),
        "b2": rnd(keys[7], (dim_out,)),
        "gn2_w": 1.0 + rnd(keys[8], (dim_out,)),
        "gn2_b": rnd(keys[9], (dim_out,)),
        "w_res": rnd(keys[10], (dim_out, dim, 1)),
        "b_res": rnd(keys[11], (dim_out,)),
    }

    x = rnd(keys[12], (B, dim, L), s=1.0)          # NCL, like PyTorch Conv1d input
    time_emb = rnd(keys[13], (B, time_emb_dim), s=1.0)
    class_emb = rnd(keys[14], (B, classes_emb_dim), s=1.0)

    out = resnet_block_forward(x, time_emb, class_emb, params, groups=groups)
    out = jax.block_until_ready(out)

    ref = ref_forward(x, time_emb, class_emb, params, groups=groups)
    np.testing.assert_allclose(np.asarray(out), np.asarray(ref), rtol=1e-4, atol=1e-4)

    print("KERNEL_OK")
</pallas_src>

<mosaic_0001>
module attributes {stable_mosaic.version = 11 : i64} {
  func.func @resnet_block_kernel(%arg0: i32, %arg1: memref<1x16x128xf32, #tpu.memory_space<vmem>>, %arg2: memref<1x1x128xf32, #tpu.memory_space<vmem>>, %arg3: memref<1x1x128xf32, #tpu.memory_space<vmem>>, %arg4: memref<384x128xf32, #tpu.memory_space<vmem>>, %arg5: memref<1x128xf32, #tpu.memory_space<vmem>>, %arg6: memref<1x128xf32, #tpu.memory_space<vmem>>, %arg7: memref<1x128xf32, #tpu.memory_space<vmem>>, %arg8: memref<384x128xf32, #tpu.memory_space<vmem>>, %arg9: memref<1x128xf32, #tpu.memory_space<vmem>>, %arg10: memref<1x128xf32, #tpu.memory_space<vmem>>, %arg11: memref<1x128xf32, #tpu.memory_space<vmem>>, %arg12: memref<128x128xf32, #tpu.memory_space<vmem>>, %arg13: memref<1x128xf32, #tpu.memory_space<vmem>>, %arg14: memref<128x8xf32, #tpu.memory_space<vmem>>, %arg15: memref<8x128xf32, #tpu.memory_space<vmem>>, %arg16: memref<1x16x128xf32, #tpu.memory_space<vmem>>) attributes {dimension_semantics = [#tpu.dimension_semantics<parallel>], iteration_bounds = array<i64: 2>, scalar_prefetch = 0 : i64, scratch_operands = 0 : i64, tpu.core_type = #tpu.core_type<tc>, window_params = [{transform_indices = @transform_0, window_bounds = array<i64: 1, 16, 128>}, {transform_indices = @transform_1, window_bounds = array<i64: 1, 1, 128>}, {transform_indices = @transform_2, window_bounds = array<i64: 1, 1, 128>}, {pipeline_mode = #tpu.pipeline_mode<synchronous>, transform_indices = @transform_3, window_bounds = array<i64: 384, 128>}, {pipeline_mode = #tpu.pipeline_mode<synchronous>, transform_indices = @transform_4, window_bounds = array<i64: 1, 128>}, {pipeline_mode = #tpu.pipeline_mode<synchronous>, transform_indices = @transform_5, window_bounds = array<i64: 1, 128>}, {pipeline_mode = #tpu.pipeline_mode<synchronous>, transform_indices = @transform_6, window_bounds = array<i64: 1, 128>}, {pipeline_mode = #tpu.pipeline_mode<synchronous>, transform_indices = @transform_7, window_bounds = array<i64: 384, 128>}, {pipeline_mode = #tpu.pipeline_mode<synchronous>, transform_indices = @transform_8, window_bounds = array<i64: 1, 128>}, {pipeline_mode = #tpu.pipeline_mode<synchronous>, transform_indices = @transform_9, window_bounds = array<i64: 1, 128>}, {pipeline_mode = #tpu.pipeline_mode<synchronous>, transform_indices = @transform_10, window_bounds = array<i64: 1, 128>}, {pipeline_mode = #tpu.pipeline_mode<synchronous>, transform_indices = @transform_11, window_bounds = array<i64: 128, 128>}, {pipeline_mode = #tpu.pipeline_mode<synchronous>, transform_indices = @transform_12, window_bounds = array<i64: 1, 128>}, {pipeline_mode = #tpu.pipeline_mode<synchronous>, transform_indices = @transform_13, window_bounds = array<i64: 128, 8>}, {pipeline_mode = #tpu.pipeline_mode<synchronous>, transform_indices = @transform_14, window_bounds = array<i64: 8, 128>}, {transform_indices = @transform_15, window_bounds = array<i64: 1, 16, 128>}]} {
    %c0 = arith.constant 0 : index
    %c0_0 = arith.constant 0 : index
    %c0_1 = arith.constant 0 : index
    %0 = vector.load %arg1[%c0, %c0_0, %c0_1] : memref<1x16x128xf32, #tpu.memory_space<vmem>>, vector<1x16x128xf32>
    %1 = vector.shape_cast %0 : vector<1x16x128xf32> to vector<16x128xf32>
    %2 = tpu.iota {dimensions = array<i32: 0>} : vector<16x1xi32>
    %c0_i32 = arith.constant 0 : i32
    %3 = vector.broadcast %c0_i32 : i32 to vector<16x1xi32>
    %4 = arith.cmpi eq, %2, %3 : vector<16x1xi32>
    %c15_i32 = arith.constant 15 : i32
    %5 = vector.broadcast %c15_i32 : i32 to vector<16x1xi32>
    %6 = arith.cmpi eq, %2, %5 : vector<16x1xi32>
    %c1_i32 = arith.constant 1 : i32
    %7 = tpu.dynamic_rotate %1 by %c1_i32 dim 0 : vector<16x128xf32>, i32 -> vector<16x128xf32>
    %cst = arith.constant 0.000000e+00 : f32
    %8 = vector.shape_cast %4 : vector<16x1xi1> to vector<16x1xi1>
    %9 = vector.broadcast %8 : vector<16x1xi1> to vector<16x128xi1>
    %10 = vector.broadcast %cst : f32 to vector<16x128xf32>
    %11 = arith.select %9, %10, %7 : vector<16x128xi1>, vector<16x128xf32>
    %c15_i32_2 = arith.constant 15 : i32
    %12 = tpu.dynamic_rotate %1 by %c15_i32_2 dim 0 : vector<16x128xf32>, i32 -> vector<16x128xf32>
    %cst_3 = arith.constant 0.000000e+00 : f32
    %13 = vector.shape_cast %6 : vector<16x1xi1> to vector<16x1xi1>
    %14 = vector.broadcast %13 : vector<16x1xi1> to vector<16x128xi1>
    %15 = vector.broadcast %cst_3 : f32 to vector<16x128xf32>
    %16 = arith.select %14, %15, %12 : vector<16x128xi1>, vector<16x128xf32>
    %17 = tpu.concatenate %11, %1, %16 in 1 : vector<16x128xf32>, vector<16x128xf32>, vector<16x128xf32> -> vector<16x384xf32>
    %c0_4 = arith.constant 0 : index
    %c0_5 = arith.constant 0 : index
    %18 = vector.load %arg4[%c0_4, %c0_5] : memref<384x128xf32, #tpu.memory_space<vmem>>, vector<384x128xf32>
    %cst_6 = arith.constant dense<0.000000e+00> : vector<16x128xf32>
    %19 = tpu.matmul %17, %18, %cst_6 {dimension_numbers = #tpu.dot_dimension_numbers<[1], [0], [0], [1], [0, 0, 1, 1], [], []>} : vector<16x384xf32>, vector<384x128xf32>, vector<16x128xf32> -> vector<16x128xf32>
    %c0_7 = arith.constant 0 : index
    %c0_8 = arith.constant 0 : index
    %20 = vector.load %arg5[%c0_7, %c0_8] : memref<1x128xf32, #tpu.memory_space<vmem>>, vector<1x128xf32>
    %21 = vector.broadcast %20 : vector<1x128xf32> to vector<16x128xf32>
    %22 = arith.addf %19, %21 : vector<16x128xf32>
    %c0_9 = arith.constant 0 : index
    %c0_10 = arith.constant 0 : index
    %23 = vector.load %arg6[%c0_9, %c0_10] : memref<1x128xf32, #tpu.memory_space<vmem>>, vector<1x128xf32>
    %c0_11 = arith.constant 0 : index
    %c0_12 = arith.constant 0 : index
    %24 = vector.load %arg7[%c0_11, %c0_12] : memref<1x128xf32, #tpu.memory_space<vmem>>, vector<1x128xf32>
    %cst_13 = arith.constant dense<0.000000e+00> : vector<128xf32>
    %25 = vector.multi_reduction <add>, %22, %cst_13 [0] : vector<16x128xf32> to vector<128xf32>
    %26 = vector.shape_cast %25 : vector<128xf32> to vector<1x128xf32>
    %27 = arith.mulf %22, %22 : vector<16x128xf32>
    %cst_14 = arith.constant dense<0.000000e+00> : vector<128xf32>
    %28 = vector.multi_reduction <add>, %27, %cst_14 [0] : vector<16x128xf32> to vector<128xf32>
    %29 = vector.shape_cast %28 : vector<128xf32> to vector<1x128xf32>
    %c0_15 = arith.constant 0 : index
    %c0_16 = arith.constant 0 : index
    %30 = vector.load %arg14[%c0_15, %c0_16] : memref<128x8xf32, #tpu.memory_space<vmem>>, vector<128x8xf32>
    %cst_17 = arith.constant dense<0.000000e+00> : vector<1x8xf32>
    %31 = tpu.matmul %26, %30, %cst_17 {dimension_numbers = #tpu.dot_dimension_numbers<[1], [0], [0], [1], [0, 0, 1, 1], [], []>} : vector<1x128xf32>, vector<128x8xf32>, vector<1x8xf32> -> vector<1x8xf32>
    %cst_18 = arith.constant 3.200000e+01 : f32
    %32 = vector.broadcast %cst_18 : f32 to vector<1x8xf32>
    %33 = arith.divf %31, %32 : vector<1x8xf32>
    %c0_19 = arith.constant 0 : index
    %c0_20 = arith.constant 0 : index
    %34 = vector.load %arg14[%c0_19, %c0_20] : memref<128x8xf32, #tpu.memory_space<vmem>>, vector<128x8xf32>
    %cst_21 = arith.constant dense<0.000000e+00> : vector<1x8xf32>
    %35 = tpu.matmul %29, %34, %cst_21 {dimension_numbers = #tpu.dot_dimension_numbers<[1], [0], [0], [1], [0, 0, 1, 1], [], []>} : vector<1x128xf32>, vector<128x8xf32>, vector<1x8xf32> -> vector<1x8xf32>
    %cst_22 = arith.constant 3.200000e+01 : f32
    %36 = vector.broadcast %cst_22 : f32 to vector<1x8xf32>
    %37 = arith.divf %35, %36 : vector<1x8xf32>
    %38 = arith.mulf %33, %33 : vector<1x8xf32>
    %39 = arith.subf %37, %38 : vector<1x8xf32>
    %cst_23 = arith.constant 9.99999974E-6 : f32
    %40 = vector.broadcast %cst_23 : f32 to vector<1x8xf32>
    %41 = arith.addf %39, %40 : vector<1x8xf32>
    %42 = math.rsqrt %41 : vector<1x8xf32>
    %c0_24 = arith.constant 0 : index
    %c0_25 = arith.constant 0 : index
    %43 = vector.load %arg15[%c0_24, %c0_25] : memref<8x128xf32, #tpu.memory_space<vmem>>, vector<8x128xf32>
    %cst_26 = arith.constant dense<0.000000e+00> : vector<1x128xf32>
    %44 = tpu.matmul %33, %43, %cst_26 {dimension_numbers = #tpu.dot_dimension_numbers<[1], [0], [0], [1], [0, 0, 1, 1], [], []>} : vector<1x8xf32>, vector<8x128xf32>, vector<1x128xf32> -> vector<1x128xf32>
    %c0_27 = arith.constant 0 : index
    %c0_28 = arith.constant 0 : index
    %45 = vector.load %arg15[%c0_27, %c0_28] : memref<8x128xf32, #tpu.memory_space<vmem>>, vector<8x128xf32>
    %cst_29 = arith.constant dense<0.000000e+00> : vector<1x128xf32>
    %46 = tpu.matmul %42, %45, %cst_29 {dimension_numbers = #tpu.dot_dimension_numbers<[1], [0], [0], [1], [0, 0, 1, 1], [], []>} : vector<1x8xf32>, vector<8x128xf32>, vector<1x128xf32> -> vector<1x128xf32>
    %47 = vector.broadcast %44 : vector<1x128xf32> to vector<16x128xf32>
    %48 = arith.subf %22, %47 : vector<16x128xf32>
    %49 = vector.broadcast %46 : vector<1x128xf32> to vector<16x128xf32>
    %50 = arith.mulf %48, %49 : vector<16x128xf32>
    %51 = vector.broadcast %23 : vector<1x128xf32> to vector<16x128xf32>
    %52 = arith.mulf %50, %51 : vector<16x128xf32>
    %53 = vector.broadcast %24 : vector<1x128xf32> to vector<16x128xf32>
    %54 = arith.addf %52, %53 : vector<16x128xf32>
    %c0_30 = arith.constant 0 : index
    %c0_31 = arith.constant 0 : index
    %c0_32 = arith.constant 0 : index
    %55 = vector.load %arg2[%c0_30, %c0_31, %c0_32] : memref<1x1x128xf32, #tpu.memory_space<vmem>>, vector<1x1x128xf32>
    %56 = vector.shape_cast %55 : vector<1x1x128xf32> to vector<1x128xf32>
    %cst_33 = arith.constant 1.000000e+00 : f32
    %57 = vector.broadcast %cst_33 : f32 to vector<1x128xf32>
    %58 = arith.addf %56, %57 : vector<1x128xf32>
    %59 = vector.broadcast %58 : vector<1x128xf32> to vector<16x128xf32>
    %60 = arith.mulf %54, %59 : vector<16x128xf32>
    %c0_34 = arith.constant 0 : index
    %c0_35 = arith.constant 0 : index
    %c0_36 = arith.constant 0 : index
    %61 = vector.load %arg3[%c0_34, %c0_35, %c0_36] : memref<1x1x128xf32, #tpu.memory_space<vmem>>, vector<1x1x128xf32>
    %62 = vector.shape_cast %61 : vector<1x1x128xf32> to vector<1x128xf32>
    %63 = vector.broadcast %62 : vector<1x128xf32> to vector<16x128xf32>
    %64 = arith.addf %60, %63 : vector<16x128xf32>
    %65 = arith.negf %64 : vector<16x128xf32>
    %66 = math.exp %65 : vector<16x128xf32>
    %cst_37 = arith.constant 1.000000e+00 : f32
    %67 = vector.broadcast %cst_37 : f32 to vector<16x128xf32>
    %68 = arith.addf %67, %66 : vector<16x128xf32>
    %69 = arith.divf %67, %68 : vector<16x128xf32>
    %70 = arith.mulf %64, %69 : vector<16x128xf32>
    %c1_i32_38 = arith.constant 1 : i32
    %71 = tpu.dynamic_rotate %70 by %c1_i32_38 dim 0 : vector<16x128xf32>, i32 -> vector<16x128xf32>
    %cst_39 = arith.constant 0.000000e+00 : f32
    %72 = vector.shape_cast %4 : vector<16x1xi1> to vector<16x1xi1>
    %73 = vector.broadcast %72 : vector<16x1xi1> to vector<16x128xi1>
    %74 = vector.broadcast %cst_39 : f32 to vector<16x128xf32>
    %75 = arith.select %73, %74, %71 : vector<16x128xi1>, vector<16x128xf32>
    %c15_i32_40 = arith.constant 15 : i32
    %76 = tpu.dynamic_rotate %70 by %c15_i32_40 dim 0 : vector<16x128xf32>, i32 -> vector<16x128xf32>
    %cst_41 = arith.constant 0.000000e+00 : f32
    %77 = vector.shape_cast %6 : vector<16x1xi1> to vector<16x1xi1>
    %78 = vector.broadcast %77 : vector<16x1xi1> to vector<16x128xi1>
    %79 = vector.broadcast %cst_41 : f32 to vector<16x128xf32>
    %80 = arith.select %78, %79, %76 : vector<16x128xi1>, vector<16x128xf32>
    %81 = tpu.concatenate %75, %70, %80 in 1 : vector<16x128xf32>, vector<16x128xf32>, vector<16x128xf32> -> vector<16x384xf32>
    %c0_42 = arith.constant 0 : index
    %c0_43 = arith.constant 0 : index
    %82 = vector.load %arg8[%c0_42, %c0_43] : memref<384x128xf32, #tpu.memory_space<vmem>>, vector<384x128xf32>
    %cst_44 = arith.constant dense<0.000000e+00> : vector<16x128xf32>
    %83 = tpu.matmul %81, %82, %cst_44 {dimension_numbers = #tpu.dot_dimension_numbers<[1], [0], [0], [1], [0, 0, 1, 1], [], []>} : vector<16x384xf32>, vector<384x128xf32>, vector<16x128xf32> -> vector<16x128xf32>
    %c0_45 = arith.constant 0 : index
    %c0_46 = arith.constant 0 : index
    %84 = vector.load %arg9[%c0_45, %c0_46] : memref<1x128xf32, #tpu.memory_space<vmem>>, vector<1x128xf32>
    %85 = vector.broadcast %84 : vector<1x128xf32> to vector<16x128xf32>
    %86 = arith.addf %83, %85 : vector<16x128xf32>
    %c0_47 = arith.constant 0 : index
    %c0_48 = arith.constant 0 : index
    %87 = vector.load %arg10[%c0_47, %c0_48] : memref<1x128xf32, #tpu.memory_space<vmem>>, vector<1x128xf32>
    %c0_49 = arith.constant 0 : index
    %c0_50 = arith.constant 0 : index
    %88 = vector.load %arg11[%c0_49, %c0_50] : memref<1x128xf32, #tpu.memory_space<vmem>>, vector<1x128xf32>
    %cst_51 = arith.constant dense<0.000000e+00> : vector<128xf32>
    %89 = vector.multi_reduction <add>, %86, %cst_51 [0] : vector<16x128xf32> to vector<128xf32>
    %90 = vector.shape_cast %89 : vector<128xf32> to vector<1x128xf32>
    %91 = arith.mulf %86, %86 : vector<16x128xf32>
    %cst_52 = arith.constant dense<0.000000e+00> : vector<128xf32>
    %92 = vector.multi_reduction <add>, %91, %cst_52 [0] : vector<16x128xf32> to vector<128xf32>
    %93 = vector.shape_cast %92 : vector<128xf32> to vector<1x128xf32>
    %c0_53 = arith.constant 0 : index
    %c0_54 = arith.constant 0 : index
    %94 = vector.load %arg14[%c0_53, %c0_54] : memref<128x8xf32, #tpu.memory_space<vmem>>, vector<128x8xf32>
    %cst_55 = arith.constant dense<0.000000e+00> : vector<1x8xf32>
    %95 = tpu.matmul %90, %94, %cst_55 {dimension_numbers = #tpu.dot_dimension_numbers<[1], [0], [0], [1], [0, 0, 1, 1], [], []>} : vector<1x128xf32>, vector<128x8xf32>, vector<1x8xf32> -> vector<1x8xf32>
    %cst_56 = arith.constant 3.200000e+01 : f32
    %96 = vector.broadcast %cst_56 : f32 to vector<1x8xf32>
    %97 = arith.divf %95, %96 : vector<1x8xf32>
    %c0_57 = arith.constant 0 : index
    %c0_58 = arith.constant 0 : index
    %98 = vector.load %arg14[%c0_57, %c0_58] : memref<128x8xf32, #tpu.memory_space<vmem>>, vector<128x8xf32>
    %cst_59 = arith.constant dense<0.000000e+00> : vector<1x8xf32>
    %99 = tpu.matmul %93, %98, %cst_59 {dimension_numbers = #tpu.dot_dimension_numbers<[1], [0], [0], [1], [0, 0, 1, 1], [], []>} : vector<1x128xf32>, vector<128x8xf32>, vector<1x8xf32> -> vector<1x8xf32>
    %cst_60 = arith.constant 3.200000e+01 : f32
    %100 = vector.broadcast %cst_60 : f32 to vector<1x8xf32>
    %101 = arith.divf %99, %100 : vector<1x8xf32>
    %102 = arith.mulf %97, %97 : vector<1x8xf32>
    %103 = arith.subf %101, %102 : vector<1x8xf32>
    %cst_61 = arith.constant 9.99999974E-6 : f32
    %104 = vector.broadcast %cst_61 : f32 to vector<1x8xf32>
    %105 = arith.addf %103, %104 : vector<1x8xf32>
    %106 = math.rsqrt %105 : vector<1x8xf32>
    %c0_62 = arith.constant 0 : index
    %c0_63 = arith.constant 0 : index
    %107 = vector.load %arg15[%c0_62, %c0_63] : memref<8x128xf32, #tpu.memory_space<vmem>>, vector<8x128xf32>
    %cst_64 = arith.constant dense<0.000000e+00> : vector<1x128xf32>
    %108 = tpu.matmul %97, %107, %cst_64 {dimension_numbers = #tpu.dot_dimension_numbers<[1], [0], [0], [1], [0, 0, 1, 1], [], []>} : vector<1x8xf32>, vector<8x128xf32>, vector<1x128xf32> -> vector<1x128xf32>
    %c0_65 = arith.constant 0 : index
    %c0_66 = arith.constant 0 : index
    %109 = vector.load %arg15[%c0_65, %c0_66] : memref<8x128xf32, #tpu.memory_space<vmem>>, vector<8x128xf32>
    %cst_67 = arith.constant dense<0.000000e+00> : vector<1x128xf32>
    %110 = tpu.matmul %106, %109, %cst_67 {dimension_numbers = #tpu.dot_dimension_numbers<[1], [0], [0], [1], [0, 0, 1, 1], [], []>} : vector<1x8xf32>, vector<8x128xf32>, vector<1x128xf32> -> vector<1x128xf32>
    %111 = vector.broadcast %108 : vector<1x128xf32> to vector<16x128xf32>
    %112 = arith.subf %86, %111 : vector<16x128xf32>
    %113 = vector.broadcast %110 : vector<1x128xf32> to vector<16x128xf32>
    %114 = arith.mulf %112, %113 : vector<16x128xf32>
    %115 = vector.broadcast %87 : vector<1x128xf32> to vector<16x128xf32>
    %116 = arith.mulf %114, %115 : vector<16x128xf32>
    %117 = vector.broadcast %88 : vector<1x128xf32> to vector<16x128xf32>
    %118 = arith.addf %116, %117 : vector<16x128xf32>
    %119 = arith.negf %118 : vector<16x128xf32>
    %120 = math.exp %119 : vector<16x128xf32>
    %cst_68 = arith.constant 1.000000e+00 : f32
    %121 = vector.broadcast %cst_68 : f32 to vector<16x128xf32>
    %122 = arith.addf %121, %120 : vector<16x128xf32>
    %123 = arith.divf %121, %122 : vector<16x128xf32>
    %124 = arith.mulf %118, %123 : vector<16x128xf32>
    %c0_69 = arith.constant 0 : index
    %c0_70 = arith.constant 0 : index
    %125 = vector.load %arg12[%c0_69, %c0_70] : memref<128x128xf32, #tpu.memory_space<vmem>>, vector<128x128xf32>
    %cst_71 = arith.constant dense<0.000000e+00> : vector<16x128xf32>
    %126 = tpu.matmul %1, %125, %cst_71 {dimension_numbers = #tpu.dot_dimension_numbers<[1], [0], [0], [1], [0, 0, 1, 1], [], []>} : vector<16x128xf32>, vector<128x128xf32>, vector<16x128xf32> -> vector<16x128xf32>
    %c0_72 = arith.constant 0 : index
    %c0_73 = arith.constant 0 : index
    %127 = vector.load %arg13[%c0_72, %c0_73] : memref<1x128xf32, #tpu.memory_space<vmem>>, vector<1x128xf32>
    %128 = vector.broadcast %127 : vector<1x128xf32> to vector<16x128xf32>
    %129 = arith.addf %126, %128 : vector<16x128xf32>
    %130 = arith.addf %124, %129 : vector<16x128xf32>
    %c0_74 = arith.constant 0 : index
    %c0_75 = arith.constant 0 : index
    %c0_76 = arith.constant 0 : index
    %131 = vector.load %arg16[%c0_74, %c0_75, %c0_76] : memref<1x16x128xf32, #tpu.memory_space<vmem>>, vector<1x16x128xf32>
    %132 = vector.shape_cast %131 : vector<1x16x128xf32> to vector<16x128xf32>
    %133 = vector.shape_cast %130 : vector<16x128xf32> to vector<1x16x128xf32>
    tpu.vector_store %arg16[%c0_74, %c0_75, %c0_76], %133 {strides = array<i32>} : memref<1x16x128xf32, #tpu.memory_space<vmem>>, vector<1x16x128xf32>,
    return
  }
  func.func @transform_0(%arg0: i32) -> (i32, i32, i32) {
    %c0_i32 = arith.constant 0 : i32
    %c0_i32_0 = arith.constant 0 : i32
    %c0_i32_1 = arith.constant 0 : i32
    return %arg0, %c0_i32, %c0_i32_0 : i32, i32, i32
  }
  func.func @transform_1(%arg0: i32) -> (i32, i32, i32) {
    %c0_i32 = arith.constant 0 : i32
    %c0_i32_0 = arith.constant 0 : i32
    %c0_i32_1 = arith.constant 0 : i32
    return %arg0, %c0_i32, %c0_i32_0 : i32, i32, i32
  }
  func.func @transform_2(%arg0: i32) -> (i32, i32, i32) {
    %c0_i32 = arith.constant 0 : i32
    %c0_i32_0 = arith.constant 0 : i32
    %c0_i32_1 = arith.constant 0 : i32
    return %arg0, %c0_i32, %c0_i32_0 : i32, i32, i32
  }
  func.func @transform_3(%arg0: i32) -> (i32, i32) {
    %c0_i32 = arith.constant 0 : i32
    %c0_i32_0 = arith.constant 0 : i32
    %c0_i32_1 = arith.constant 0 : i32
    return %c0_i32, %c0_i32_0 : i32, i32
  }
  func.func @transform_4(%arg0: i32) -> (i32, i32) {
    %c0_i32 = arith.constant 0 : i32
    %c0_i32_0 = arith.constant 0 : i32
    %c0_i32_1 = arith.constant 0 : i32
    return %c0_i32, %c0_i32_0 : i32, i32
  }
  func.func @transform_5(%arg0: i32) -> (i32, i32) {
    %c0_i32 = arith.constant 0 : i32
    %c0_i32_0 = arith.constant 0 : i32
    %c0_i32_1 = arith.constant 0 : i32
    return %c0_i32, %c0_i32_0 : i32, i32
  }
  func.func @transform_6(%arg0: i32) -> (i32, i32) {
    %c0_i32 = arith.constant 0 : i32
    %c0_i32_0 = arith.constant 0 : i32
    %c0_i32_1 = arith.constant 0 : i32
    return %c0_i32, %c0_i32_0 : i32, i32
  }
  func.func @transform_7(%arg0: i32) -> (i32, i32) {
    %c0_i32 = arith.constant 0 : i32
    %c0_i32_0 = arith.constant 0 : i32
    %c0_i32_1 = arith.constant 0 : i32
    return %c0_i32, %c0_i32_0 : i32, i32
  }
  func.func @transform_8(%arg0: i32) -> (i32, i32) {
    %c0_i32 = arith.constant 0 : i32
    %c0_i32_0 = arith.constant 0 : i32
    %c0_i32_1 = arith.constant 0 : i32
    return %c0_i32, %c0_i32_0 : i32, i32
  }
  func.func @transform_9(%arg0: i32) -> (i32, i32) {
    %c0_i32 = arith.constant 0 : i32
    %c0_i32_0 = arith.constant 0 : i32
    %c0_i32_1 = arith.constant 0 : i32
    return %c0_i32, %c0_i32_0 : i32, i32
  }
  func.func @transform_10(%arg0: i32) -> (i32, i32) {
    %c0_i32 = arith.constant 0 : i32
    %c0_i32_0 = arith.constant 0 : i32
    %c0_i32_1 = arith.constant 0 : i32
    return %c0_i32, %c0_i32_0 : i32, i32
  }
  func.func @transform_11(%arg0: i32) -> (i32, i32) {
    %c0_i32 = arith.constant 0 : i32
    %c0_i32_0 = arith.constant 0 : i32
    %c0_i32_1 = arith.constant 0 : i32
    return %c0_i32, %c0_i32_0 : i32, i32
  }
  func.func @transform_12(%arg0: i32) -> (i32, i32) {
    %c0_i32 = arith.constant 0 : i32
    %c0_i32_0 = arith.constant 0 : i32
    %c0_i32_1 = arith.constant 0 : i32
    return %c0_i32, %c0_i32_0 : i32, i32
  }
  func.func @transform_13(%arg0: i32) -> (i32, i32) {
    %c0_i32 = arith.constant 0 : i32
    %c0_i32_0 = arith.constant 0 : i32
    %c0_i32_1 = arith.constant 0 : i32
    return %c0_i32, %c0_i32_0 : i32, i32
  }
  func.func @transform_14(%arg0: i32) -> (i32, i32) {
    %c0_i32 = arith.constant 0 : i32
    %c0_i32_0 = arith.constant 0 : i32
    %c0_i32_1 = arith.constant 0 : i32
    return %c0_i32, %c0_i32_0 : i32, i32
  }
  func.func @transform_15(%arg0: i32) -> (i32, i32, i32) {
    %c0_i32 = arith.constant 0 : i32
    %c0_i32_0 = arith.constant 0 : i32
    %c0_i32_1 = arith.constant 0 : i32
    return %arg0, %c0_i32, %c0_i32_0 : i32, i32, i32
  }
}

</mosaic_0001>

<bundles_post_ra>
// kernel: tpu_custom_call.1
= control target key start
LH: loop header
LB: loop body
LE: loop exit
PB: predicated region body
PF: predicated region fallthrough
CT: control target
= control target key end

     0   :  { %s4036_s0 = inlined_call_operand.vmem [shape: f32[2,16,128], index: 0, kind: input, shape index: {}]   ;;  %s4037_s1 = inlined_call_operand.vmem [shape: f32[2,1,128], index: 1, kind: input, shape index: {}]   ;;  %s4038_s2 = inlined_call_operand.vmem [shape: f32[2,1,128], index: 2, kind: input, shape index: {}]   ;;  %s4039_s3 = inlined_call_operand.hbm [shape: f32[384,128], index: 3, kind: input, shape index: {}]   ;;  %s4040_s4 = inlined_call_operand.vmem [shape: f32[1,128], index: 4, kind: input, shape index: {}]   ;;  %s4041_s5 = inlined_call_operand.hbm [shape: f32[1,128], index: 5, kind: input, shape index: {}]   ;;  %s4042_s6 = inlined_call_operand.hbm [shape: f32[1,128], index: 6, kind: input, shape index: {}]   ;;  %s4043_s7 = inlined_call_operand.hbm [shape: f32[384,128], index: 7, kind: input, shape index: {}]   ;;  %s4044_s8 = inlined_call_operand.hbm [shape: f32[1,128], index: 8, kind: input, shape index: {}]   ;;  %s4045_s9 = inlined_call_operand.hbm [shape: f32[1,128], index: 9, kind: input, shape index: {}]   ;;  %s4046_s10 = inlined_call_operand.hbm [shape: f32[1,128], index: 10, kind: input, shape index: {}]   ;;  %s4047_s11 = inlined_call_operand.vmem [shape: f32[128,128], index: 11, kind: input, shape index: {}]   ;;  %s4048_s12 = inlined_call_operand.hbm [shape: f32[1,128], index: 12, kind: input, shape index: {}]   ;;  %s4049_s13 = inlined_call_operand.vmem [shape: f32[128,8], index: 13, kind: input, shape index: {}]   ;;  %s4050_s14 = inlined_call_operand.vmem [shape: f32[8,128], index: 14, kind: input, shape index: {}]   ;;  %s4051_s15 = inlined_call_operand.hbm [shape: f32[2,16,128], index: 15, kind: output, shape index: {}]  }
   0x1   :  { %4067 = sst [smem:[#allocation31_spill]] %s4041_s5 }
   0x2   :  { %4068 = sst [smem:[#allocation32_spill]] %s4051_s15 }
   0x3   :  { %20 = vsyncpa [#allocation3], 0 }
   0x4   :  { %21 = vsyncpa [#allocation6], 0 }
   0x5   :  { %22 = vsyncpa [#allocation9], 0 }
   0x6   :  { %23 = vsyncpa [#allocation12], 0 }
   0x7   :  { %24 = vsyncpa [#allocation15], 0 }
   0x8   :  { %25 = vsyncpa [#allocation4], 0 }
   0x9   :  { %27 = vsyncpa [#allocation4 + $0x1], 0  ;;  %s3430_s18 = smov 0   ;;  %s3432_s19 = smov 0  }
   0xa   :  { %s3434_s20 = smov 0   ;;  %s3436_s21 = smov 0  }
   0xb LB: > { %4069 = sst [smem:[#allocation23_spill]] %s3320_s18  ;;  %s3451_s22 = sadd.s32 4294967295, %s3332_s21   ;;  %s3332_s21 = sphi %s3436_s21, %s4104_s21   ;;  %s3328_s20 = sphi %s3434_s20, %s4107_s20   ;;  %s3324_s19 = sphi %s3432_s19, %s4106_s19   ;;  %s3320_s18 = sphi %s3430_s18, %s4105_s18  }
   0xc   : > { %4070 = sst [smem:[#allocation24_spill]] %s3324_s19  ;;  %s2096_s23 = sadd.s32 4294967294, %s3332_s21  }
   0xd   : > { %4071 = sst [smem:[#allocation25_spill]] %s3328_s20  ;;  %s3455_s24 = sadd.s32 1, %s3332_s21  }
   0xe   : > { %4072 = sst [smem:[#allocation26_spill]] %s3332_s21  ;;  %s370_s25 = sadd.s32 1, %s3328_s20 }
   0xf   : > { %4073 = sst [smem:[#allocation27_spill]] %s3455_s24  ;;  %s367_s26 = ssub.s32 %s3332_s21, %s3455_s24 }
  0x10   : > { %p380_p0 = scmp.ne.s32.totalorder %s3328_s20, %s3324_s19  ;;  %p368_p1 = scmp.eq.s32.totalorder %s367_s26, 0 }
  0x11   : > { %p381_p2 = scmp.eq.s32.totalorder %s3451_s22, 1  ;;  %p386_p3 = scmp.ne.s32.totalorder %s3324_s19, %s3320_s18 }
  0x12   : > { %p387_p4 = scmp.eq.s32.totalorder %s2096_s23, 1  ;;  %p2097_p7 = scmp.ge.s32.totalorder %s3332_s21, 1 }
  0x13   : > { %s3466_s27 = scalar_select %p368_p1, %s3328_s20, %s370_s25  }
  0x14   : > { %p3468_p5 = por %p381_p2, %p380_p0  ;;  %p3472_p6 = por %p387_p4, %p386_p3 }
  0x15   : > { %4074 = sst [smem:[#allocation28_spill]] %s3466_s27  ;;  %p394_p8 = scmp.lt.s32.totalorder %s3332_s21, 3 }
  0x16   : > { %s4075_s28 = scalar_select %p3468_p5, 1, 0 }
  0x17   : > { %s4077_s29 = scalar_select %p3472_p6, 1, 0 }
  0x18   : > { %4076 = sst [smem:[#allocation29_spill]] %s4075_s28  ;;  %p4059_p9 = scmp.eq.s32.totalorder %s3451_s22, 0 }
  0x19   : > { %4078 = sst [smem:[#allocation30_spill]] %s4077_s29  ;;  %p3479_p10 = pnand %p2097_p7, %p394_p8 }
  0x1a   : > { %s3334_s16 = smov [#allocation5]   ;;  %s3335_s25 = smov [#allocation8]  }
  0x1b   : > { %s4079_s30 = scalar_select %p3479_p10, 1, 0 }
  0x1c   : > { %s423_s17 = sshll.u32 %s3334_s16, 4  ;;  %p2913_p11 = pneg %p3479_p10  ;;  %s424_s17 = int_to_ptr.vmem [resolvable:$true] %s423_s17 }
  0x1d   : > { %s444_s26 = sshll.u32 %s3335_s25, 4  ;;  %s3336_s27 = smov [#allocation11]   ;;  %s3491_s26 = int_to_ptr.vmem [resolvable:$true] %s444_s26 }
  0x1e   : > { %p3487_p12 = pnand %p4059_p9, %p2913_p11  ;;  %s3493_s20 = sshll.u32 %s3336_s27, 4  ;;  %s470_s20 = int_to_ptr.vmem [resolvable:$true] %s3493_s20 }
  0x1f   : > { %s4081_s5 = sld [smem:[#allocation31_spill]] }
  0x20   : > { %p3503_p0 = pneg %p3487_p12 }
  0x25   : > { %s3026_s16 = scalar_lea.hbm %s4081_s5, 16 }
  0x26   : > { %p3027_p13 = scmp.ne.s32.totalorder %s4081_s5, %s3026_s16  ;;  %p3033_p3 = scmp.lt.u32.totalorder %s3026_s16, %s4081_s5 }
  0x28   : > { %p3029_p1 = pnand %p3503_p0, %p3027_p13 }
  0x2a   : > { %p3030_p2 = pneg %p3029_p1 }
  0x2c   : > { %p3035_p4 = pnand %p3033_p3, %p3030_p2 }
  0x2e   : > { %3038 = shalt.err (!%p3035_p4)
}
  0x2f   : > { %s3039_s24 = scalar_lea.vmem %s424_s17, 16  ;;  %s3046_s18 = scalar_lea.vmem %s424_s17, 32 }
  0x30   : > { %p3040_p7 = scmp.ne.s32.totalorder %s424_s17, %s3039_s24  ;;  %p3047_p9 = scmp.lt.s32.totalorder %s424_s17, %s424_s17 }
  0x31   : > { %p3048_p6 = scmp.lt.s32.totalorder %s3046_s18, %s3039_s24 }
  0x32   : > { %p3042_p8 = pnand %p3040_p7, %p3503_p0 }
  0x33   : > { %p3049_p5 = por %p3048_p6, %p3047_p9 }
  0x34   : > { %p3043_p11 = pneg %p3042_p8 }
  0x36   : > { %p3050_p10 = pnand %p3049_p5, %p3043_p11 }
  0x38   : > { %3053 = shalt.err (!%p3050_p10)
}
  0x39   : > { %2919 = dma.hbm_to_vmem [thread:$0]  (!%p3487_p12), %s4081_s5, 16, %s424_s17, [#allocation6]  }
  0x3a   : > { %s3054_s27 = scalar_lea.hbm %s4043_s7, 6144 }
  0x3b   : > { %p3055_p13 = scmp.ne.s32.totalorder %s4043_s7, %s3054_s27  ;;  %p3061_p5 = scmp.lt.u32.totalorder %s3054_s27, %s4043_s7 }
  0x3d   : > { %p3057_p1 = pnand %p3055_p13, %p3503_p0 }
  0x3f   : > { %p3058_p6 = pneg %p3057_p1 }
  0x41   : > { %p3063_p9 = pnand %p3061_p5, %p3058_p6 }
  0x43   : > { %3066 = shalt.err (!%p3063_p9)
}
  0x44   : > { %s3067_s17 = scalar_lea.vmem %s3491_s26, 6144  ;;  %p3075_p4 = scmp.lt.s32.totalorder %s3491_s26, %s3491_s26 }
  0x45   : > { %p3068_p10 = scmp.ne.s32.totalorder %s3491_s26, %s3067_s17  ;;  %p3076_p7 = scmp.lt.s32.totalorder %s3067_s17, %s3067_s17 }
  0x47   : > { %p3070_p2 = pnand %p3068_p10, %p3503_p0  ;;  %p3077_p8 = por %p3076_p7, %p3075_p4 }
  0x49   : > { %p3071_p3 = pneg %p3070_p2 }
  0x4b   : > { %p3078_p11 = pnand %p3077_p8, %p3071_p3 }
  0x4d   : > { %3081 = shalt.err (!%p3078_p11)
}
  0x4e   : > { %s4065_s19 = smov 128   ;;  %s4066_s28 = smov 8  }
  0x4f   : > { %2925 = dma.hbm_to_vmem [thread:$0]  (!%p3487_p12), %s4043_s7, 6144, %s3491_s26, [#allocation9], %s4065_s19, %s4065_s19, %s4066_s28  }
  0x50   : > { %s3082_s27 = scalar_lea.hbm %s4045_s9, 16 }
  0x51   : > { %p3083_p13 = scmp.ne.s32.totalorder %s4045_s9, %s3082_s27  ;;  %p3089_p5 = scmp.lt.u32.totalorder %s3082_s27, %s4045_s9 }
  0x53   : > { %p3085_p1 = pnand %p3083_p13, %p3503_p0 }
  0x55   : > { %p3086_p6 = pneg %p3085_p1 }
  0x57   : > { %p3091_p9 = pnand %p3089_p5, %p3086_p6 }
  0x59   : > { %3094 = shalt.err (!%p3091_p9)
}
  0x5a   : > { %s3095_s21 = scalar_lea.vmem %s470_s20, 16  ;;  %s3102_s26 = scalar_lea.vmem %s470_s20, 32 }
  0x5b   : > { %p3096_p10 = scmp.ne.s32.totalorder %s470_s20, %s3095_s21  ;;  %p3103_p4 = scmp.lt.s32.totalorder %s470_s20, %s470_s20 }
  0x5c   : > { %p3104_p7 = scmp.lt.s32.totalorder %s3102_s26, %s3095_s21 }
  0x5d   : > { %p3098_p2 = pnand %p3096_p10, %p3503_p0 }
  0x5e   : > { %p3105_p8 = por %p3104_p7, %p3103_p4 }
  0x5f   : > { %p3099_p3 = pneg %p3098_p2 }
  0x61   : > { %p3106_p11 = pnand %p3105_p8, %p3099_p3 }
  0x63   : > { %3109 = shalt.err (!%p3106_p11)
}
  0x64   : > { %2931 = dma.hbm_to_vmem [thread:$0]  (!%p3487_p12), %s4045_s9, 16, %s470_s20, [#allocation12]  }
  0x65   : > { %s3339_s5 = smov [#allocation2]   ;;  %s3340_s27 = smov [#allocation7]  }
  0x66   : > { %s406_s25 = sshll.u32 %s3339_s5, 4  ;;  %s434_s24 = sshll.u32 %s3340_s27, 4  ;;  %s407_s25 = int_to_ptr.vmem [resolvable:$true] %s406_s25  ;;  %s435_s24 = int_to_ptr.vmem [resolvable:$true] %s434_s24 }
  0x67   : > { %s3110_s19 = scalar_lea.hbm %s4039_s3, 6144 }
  0x68   : > { %p3111_p13 = scmp.ne.s32.totalorder %s4039_s3, %s3110_s19  ;;  %p3117_p5 = scmp.lt.u32.totalorder %s3110_s19, %s4039_s3 }
  0x6a   : > { %p3113_p1 = pnand %p3111_p13, %p3503_p0 }
  0x6c   : > { %p3114_p6 = pneg %p3113_p1 }
  0x6e   : > { %p3119_p9 = pnand %p3117_p5, %p3114_p6 }
  0x70   : > { %3122 = shalt.err (!%p3119_p9)
}
  0x71   : > { %s3123_s20 = scalar_lea.vmem %s407_s25, 6144  ;;  %p3131_p4 = scmp.lt.s32.totalorder %s407_s25, %s407_s25 }
  0x72   : > { %p3124_p10 = scmp.ne.s32.totalorder %s407_s25, %s3123_s20  ;;  %p3132_p7 = scmp.lt.s32.totalorder %s3123_s20, %s3123_s20 }
  0x74   : > { %p3126_p2 = pnand %p3124_p10, %p3503_p0  ;;  %p3133_p8 = por %p3132_p7, %p3131_p4 }
  0x76   : > { %p3127_p3 = pneg %p3126_p2 }
  0x78   : > { %p3134_p11 = pnand %p3133_p8, %p3127_p3 }
  0x7a   : > { %3137 = shalt.err (!%p3134_p11)
}
  0x7b   : > { %s4083_s16 = smov 8   ;;  %s4084_s5 = smov 128  }
  0x7c   : > { %2916 = dma.hbm_to_vmem [thread:$0]  (!%p3487_p12), %s4039_s3, 6144, %s407_s25, [#allocation3], %s4084_s5, %s4084_s5, %s4083_s16  }
  0x7d   : > { %s3138_s17 = scalar_lea.hbm %s4042_s6, 16 }
  0x7e   : > { %p3139_p13 = scmp.ne.s32.totalorder %s4042_s6, %s3138_s17  ;;  %p3145_p5 = scmp.lt.u32.totalorder %s3138_s17, %s4042_s6 }
  0x80   : > { %p3141_p1 = pnand %p3139_p13, %p3503_p0 }
  0x82   : > { %p3142_p6 = pneg %p3141_p1 }
  0x84   : > { %p3147_p9 = pnand %p3145_p5, %p3142_p6 }
  0x86   : > { %3150 = shalt.err (!%p3147_p9)
}
  0x87   : > { %s3151_s28 = scalar_lea.vmem %s435_s24, 16  ;;  %s3158_s25 = scalar_lea.vmem %s435_s24, 32 }
  0x88   : > { %p3152_p10 = scmp.ne.s32.totalorder %s435_s24, %s3151_s28  ;;  %p3159_p4 = scmp.lt.s32.totalorder %s435_s24, %s435_s24 }
  0x89   : > { %p3160_p7 = scmp.lt.s32.totalorder %s3158_s25, %s3151_s28 }
  0x8a   : > { %p3154_p2 = pnand %p3152_p10, %p3503_p0 }
  0x8b   : > { %p3161_p8 = por %p3160_p7, %p3159_p4 }
  0x8c   : > { %p3155_p3 = pneg %p3154_p2 }
  0x8e   : > { %p3162_p11 = pnand %p3161_p8, %p3155_p3 }
  0x90   : > { %3165 = shalt.err (!%p3162_p11)
}
  0x91   : > { %2922 = dma.hbm_to_vmem [thread:$0]  (!%p3487_p12), %s4042_s6, 16, %s435_s24, [#allocation6]  }
  0x92   : > { %s3341_s19 = smov [#allocation10]   ;;  %s3342_s18 = smov [#allocation13]  }
  0x93   : > { %s458_s27 = sshll.u32 %s3341_s19, 4  ;;  %s480_s17 = sshll.u32 %s3342_s18, 4  ;;  %s459_s27 = int_to_ptr.vmem [resolvable:$true] %s458_s27  ;;  %s481_s17 = int_to_ptr.vmem [resolvable:$true] %s480_s17 }
  0x94   : > { %s3166_s29 = scalar_lea.hbm %s4044_s8, 16 }
  0x95   : > { %p3167_p13 = scmp.ne.s32.totalorder %s4044_s8, %s3166_s29  ;;  %p3173_p5 = scmp.lt.u32.totalorder %s3166_s29, %s4044_s8 }
  0x97   : > { %p3169_p1 = pnand %p3167_p13, %p3503_p0 }
  0x99   : > { %p3170_p6 = pneg %p3169_p1 }
  0x9b   : > { %p3175_p9 = pnand %p3173_p5, %p3170_p6 }
  0x9d   : > { %3178 = shalt.err (!%p3175_p9)
}
  0x9e   : > { %s3179_s24 = scalar_lea.vmem %s459_s27, 16  ;;  %s3186_s5 = scalar_lea.vmem %s459_s27, 32 }
  0x9f   : > { %p3180_p10 = scmp.ne.s32.totalorder %s459_s27, %s3179_s24  ;;  %p3187_p4 = scmp.lt.s32.totalorder %s459_s27, %s459_s27 }
  0xa0   : > { %p3188_p7 = scmp.lt.s32.totalorder %s3186_s5, %s3179_s24 }
  0xa1   : > { %p3182_p2 = pnand %p3180_p10, %p3503_p0 }
  0xa2   : > { %p3189_p8 = por %p3188_p7, %p3187_p4 }
  0xa3   : > { %p3183_p3 = pneg %p3182_p2 }
  0xa5   : > { %p3190_p11 = pnand %p3189_p8, %p3183_p3 }
  0xa7   : > { %3193 = shalt.err (!%p3190_p11)
}
  0xa8   : > { %2928 = dma.hbm_to_vmem [thread:$0]  (!%p3487_p12), %s4044_s8, 16, %s459_s27, [#allocation9]  }
  0xa9   : > { %s3194_s29 = scalar_lea.hbm %s4046_s10, 16 }
  0xaa   : > { %p3195_p13 = scmp.ne.s32.totalorder %s4046_s10, %s3194_s29  ;;  %p3201_p5 = scmp.lt.u32.totalorder %s3194_s29, %s4046_s10 }
  0xac   : > { %p3197_p1 = pnand %p3195_p13, %p3503_p0 }
  0xae   : > { %p3198_p6 = pneg %p3197_p1 }
  0xb0   : > { %p3203_p9 = pnand %p3201_p5, %p3198_p6 }
  0xb2   : > { %3206 = shalt.err (!%p3203_p9)
}
  0xb3   : > { %s3207_s24 = scalar_lea.vmem %s481_s17, 16  ;;  %s3214_s27 = scalar_lea.vmem %s481_s17, 32 }
  0xb4   : > { %p3208_p10 = scmp.ne.s32.totalorder %s481_s17, %s3207_s24  ;;  %p3215_p4 = scmp.lt.s32.totalorder %s481_s17, %s481_s17 }
  0xb5   : > { %p3216_p7 = scmp.lt.s32.totalorder %s3214_s27, %s3207_s24 }
  0xb6   : > { %p3210_p2 = pnand %p3208_p10, %p3503_p0 }
  0xb7   : > { %p3217_p8 = por %p3216_p7, %p3215_p4 }
  0xb8   : > { %p3211_p3 = pneg %p3210_p2 }
  0xba   : > { %p3218_p11 = pnand %p3217_p8, %p3211_p3 }
  0xbc   : > { %3221 = shalt.err (!%p3218_p11)
}
  0xbd   : > { %2934 = dma.hbm_to_vmem [thread:$0]  (!%p3487_p12), %s4046_s10, 16, %s481_s17, [#allocation12]  }
  0xbe   : > { %s3343_s18 = smov [#allocation14]   ;;  %s3222_s20 = scalar_lea.hbm %s4048_s12, 16 }
  0xbf   : > { %s494_s21 = sshll.u32 %s3343_s18, 4  ;;  %p3223_p13 = scmp.ne.s32.totalorder %s4048_s12, %s3222_s20  ;;  %s495_s21 = int_to_ptr.vmem [resolvable:$true] %s494_s21 }
  0xc0   : > { %p3229_p5 = scmp.lt.u32.totalorder %s3222_s20, %s4048_s12 }
  0xc1   : > { %p3225_p1 = pnand %p3223_p13, %p3503_p0 }
  0xc3   : > { %p3226_p6 = pneg %p3225_p1 }
  0xc5   : > { %p3231_p9 = pnand %p3229_p5, %p3226_p6 }
  0xc7   : > { %3234 = shalt.err (!%p3231_p9)
}
  0xc8   : > { %s3235_s17 = scalar_lea.vmem %s495_s21, 16  ;;  %s3242_s27 = scalar_lea.vmem %s495_s21, 32 }
  0xc9   : > { %p3236_p10 = scmp.ne.s32.totalorder %s495_s21, %s3235_s17  ;;  %p3243_p4 = scmp.lt.s32.totalorder %s495_s21, %s495_s21 }
  0xca   : > { %p3244_p7 = scmp.lt.s32.totalorder %s3242_s27, %s3235_s17 }
  0xcb   : > { %p3238_p2 = pnand %p3236_p10, %p3503_p0 }
  0xcc   : > { %p3245_p8 = por %p3244_p7, %p3243_p4 }
  0xcd   : > { %p3239_p3 = pneg %p3238_p2 }
  0xcf   : > { %p3246_p11 = pnand %p3245_p8, %p3239_p3 }
  0xd1   : > { %3249 = shalt.err (!%p3246_p11)
}
  0xd2   : > { %2937 = dma.hbm_to_vmem [thread:$0]  (!%p3487_p12), %s4048_s12, 16, %s495_s21, [#allocation15]  }
  0xd3   : > { %p4085_p13 = scmp.ne.s32.totalorder %s4079_s30, 0 }
  0xd4   : > { %p4086_p1 = scmp.eq.s32.totalorder (!%p4085_p13), %s3451_s22, 0 }
  0xd5   : > { %533 = sbr.rel (%p4085_p13) target bundleno = 1727 (0x6bf), region = 80 }
  0xdc   : > { %3295 = dma.done.wait (%p4086_p1), [#allocation3], 6144   ;;  %p4087_p0 = pmov %p4086_p1 }
  0xde   : > { %3297 = vsyncadd (%p4087_p0), [#allocation3], 4294961152  ;;  %p4088_p6 = pmov %p4087_p0 }
  0xdf   : > { %p4089_p5 = pmov %p4087_p0 }
  0xe0   : > { %3299 = dma.done.wait (%p4088_p6), [#allocation6], 32  }
  0xe1   : > { %3301 = vsyncadd (%p4089_p5), [#allocation6], 4294967264  ;;  %p4090_p9 = pmov %p4087_p0 }
  0xe2   : > { %p4091_p12 = pmov %p4087_p0 }
  0xe3   : > { %3303 = dma.done.wait (%p4090_p9), [#allocation9], 6160  }
  0xe4   : > { %3305 = vsyncadd (%p4091_p12), [#allocation9], 4294961136  ;;  %p4092_p10 = pmov %p4087_p0 }
  0xe5   : > { %p4093_p2 = pmov %p4087_p0 }
  0xe6   : > { %3307 = dma.done.wait (%p4092_p10), [#allocation12], 32  }
  0xe7   : > { %3309 = vsyncadd (%p4093_p2), [#allocation12], 4294967264  ;;  %p4094_p3 = pmov %p4087_p0 }
  0xe8   : > { %p4095_p4 = pmov %p4087_p0 }
  0xe9   : > { %3311 = dma.done.wait (%p4094_p3), [#allocation15], 16  }
  0xea   : > { %3313 = vsyncadd (%p4095_p4), [#allocation15], 4294967280  ;;  %v673_v0 = vld [vmem:[#allocation2 + $0x80] sm:$0xff]  ;;  %v674_v1 = vld [vmem:[#allocation2 + $0x88] sm:$0xff]  ;;  %p615_p7 = scmp.lt.s32.totalorder %s3451_s22, 1  ;;  %v628_v36 = vlaneseq  ;;  %vm3345_vm4 = vmmov 0  }
  0xeb   : > { %v657_v2 = vld [vmem:[#allocation2] sm:$0xff]  ;;  %v2623_v3 = vpack.c.bf16 %v674_v1, %v673_v0  ;;  %v658_v4 = vld [vmem:[#allocation2 + $0x8] sm:$0xff]  ;;  %v675_v5 = vld [vmem:[#allocation2 + $0x90] sm:$0xff]  ;;  %vm1044_vm5 = vcmask 64512   ;;  %s4097_s26 = sld [smem:[#allocation29_spill]]  ;;  %s2149_s20 = sshll.u32 %s3451_s22, 8 }
  0xec   : > { %v676_v6 = vld [vmem:[#allocation2 + $0x98] sm:$0xff]  ;;  %v2625_v7 = vpack.c.bf16 %v658_v4, %v657_v2  ;;  %v689_v9 = vld [vmem:[#allocation2 + $0x100] sm:$0xff]  ;;  %v690_v10 = vld [vmem:[#allocation2 + $0x108] sm:$0xff]  ;;  %s3683_s15 = scalar_select %p615_p7, %s3451_s22, 1  ;;  %v3689_v46 = vshrl.u32 %v628_v36, 7 }
  0xed   : > { %v2627_v8 = vpack.c.bf16 %v676_v6, %v675_v5  ;;  %v659_v11 = vld [vmem:[#allocation2 + $0x10] sm:$0xff]  ;;  %2624 = vmatprep.subr.bf16.mxu0 %v2623_v3  ;;  %v2655_v12 = vpack.c.bf16 %v690_v10, %v689_v9  ;;  %v660_v13 = vld [vmem:[#allocation2 + $0x18] sm:$0xff]  ;;  %v677_v14 = vld [vmem:[#allocation2 + $0xa0] sm:$0xff]  ;;  %s4098_s16 = sld [smem:[#allocation32_spill]]  ;;  %s3347_s22 = smov [#allocation16]  }
  0xee   : > { %v678_v15 = vld [vmem:[#allocation2 + $0xa8] sm:$0xff]  ;;  %2626 = vmatpush3.bf16.msra.mxu0 %v2625_v7  ;;  %v2629_v16 = vpack.c.bf16 %v660_v13, %v659_v11  ;;  %v691_v17 = vld [vmem:[#allocation2 + $0x110] sm:$0xff]  ;;  %v692_v18 = vld [vmem:[#allocation2 + $0x118] sm:$0xff]  ;;  %s2148_s30 = sshll.u32 %s3683_s15, 4  ;;  %vm648_vm0 = vcmp.lt.s32.totalorder %v3689_v46, 7  ;;  %vm637_vm1 = vcmp.lt.s32.totalorder %v3689_v46, 1  ;;  %s622_s27 = scalar_lea.vmem %s4037_s1, %s3683_s15 }
  0xef   : > { %2628 = vmatprep.subr.bf16.mxu0 %v2627_v8  ;;  %2656 = vmatprep.subr.bf16.mxu1 %v2655_v12  ;;  %v2631_v19 = vpack.c.bf16 %v678_v15, %v677_v14  ;;  %v2659_v20 = vpack.c.bf16 %v692_v18, %v691_v17  ;;  %v661_v21 = vld [vmem:[#allocation2 + $0x20] sm:$0xff]  ;;  %v662_v22 = vld [vmem:[#allocation2 + $0x28] sm:$0xff]  ;;  %v679_v23 = vld [vmem:[#allocation2 + $0xb0] sm:$0xff]  ;;  %s619_s21 = scalar_lea.vmem %s4036_s0, %s2148_s30  ;;  %vm2150_vm2 = vcmp.ne.s32.totalorder %v3689_v46, 0  ;;  %s625_s30 = scalar_lea.vmem %s4038_s2, %s3683_s15 }
  0xf0   : > { %2658 = vmatpush3.bf16.msra.mxu1 %v2655_v12  ;;  %v680_v24 = vld [vmem:[#allocation2 + $0xb8] sm:$0xff]  ;;  %v693_v25 = vld [vmem:[#allocation2 + $0x120] sm:$0xff]  ;;  %v694_v26 = vld [vmem:[#allocation2 + $0x128] sm:$0xff]  ;;  %v2633_v28 = vpack.c.bf16 %v662_v22, %v661_v21  ;;  %v3344_v22 = vmov 0.0|0.0   ;;  %s4096_s15 = sld [smem:[#allocation24_spill]]  ;;  %s3254_s5 = sshll.u32 %s3347_s22, 4  ;;  %s3255_s5 = int_to_ptr.vmem [resolvable:$false] %s3254_s5 }
  0xf1   : > { %2660 = vmatprep.subr.bf16.mxu1 %v2659_v20  ;;  %v2663_v27 = vpack.c.bf16 %v694_v26, %v693_v25  ;;  %v695_v29 = vld [vmem:[#allocation2 + $0x130] sm:$0xff]  ;;  %v696_v30 = vld [vmem:[#allocation2 + $0x138] sm:$0xff]  ;;  %v2635_v31 = vpack.c.bf16 %v680_v24, %v679_v23  ;;  %v681_v34 = vld [vmem:[#allocation2 + $0xc0] sm:$0xff]  ;;  %p4099_p11 = scmp.ne.s32.totalorder %s4097_s26, 0  ;;  %s3256_s19 = scalar_lea.vmem %s3255_s5, 512 }
  0xf2   : > { %2630 = vmatpush3.bf16.msra.mxu0 %v2629_v16  ;;  %v663_v32 = vld [vmem:[#allocation2 + $0x30] sm:$0xff]  ;;  %v664_v33 = vld [vmem:[#allocation2 + $0x38] sm:$0xff]  ;;  %v682_v35 = vld [vmem:[#allocation2 + $0xc8] sm:$0xff]  ;;  %v2667_v37 = vpack.c.bf16 %v696_v30, %v695_v29 }
  0xf3   : > { %2632 = vmatprep.subr.bf16.mxu0 %v2631_v19  ;;  %v2637_v38 = vpack.c.bf16 %v664_v33, %v663_v32  ;;  %v697_v39 = vld [vmem:[#allocation2 + $0x140] sm:$0xff]  ;;  %v698_v40 = vld [vmem:[#allocation2 + $0x148] sm:$0xff]  ;;  %v2639_v41 = vpack.c.bf16 %v682_v35, %v681_v34  ;;  %v683_v44 = vld [vmem:[#allocation2 + $0xd0] sm:$0xff]  ;;  %v3711_v19 = vadd.s32 8, %v3689_v46  ;;  %s3993_s24 = scalar_lea.hbm %s4098_s16, %s2149_s20 }
  0xf4   : > { %2662 = vmatpush3.bf16.msra.mxu1 %v2659_v20  ;;  %v665_v42 = vld [vmem:[#allocation2 + $0x40] sm:$0xff]  ;;  %v666_v43 = vld [vmem:[#allocation2 + $0x48] sm:$0xff]  ;;  %v684_v45 = vld [vmem:[#allocation2 + $0xd8] sm:$0xff]  ;;  %v2671_v47 = vpack.c.bf16 %v698_v40, %v697_v39 }
  0xf5   : > { %2664 = vmatprep.subr.bf16.mxu1 %v2663_v27  ;;  %v3691_v48 = vld [vmem:[%s619_s21] sm:$0xff]  ;;  %v2641_v49 = vpack.c.bf16 %v666_v43, %v665_v42  ;;  %v699_v50 = vld [vmem:[#allocation2 + $0x150] sm:$0xff]  ;;  %v700_v51 = vld [vmem:[#allocation2 + $0x158] sm:$0xff]  ;;  %v2643_v54 = vpack.c.bf16 %v684_v45, %v683_v44  ;;  %vm2151_vm3 = vcmp.ne.s32.totalorder %v3711_v19, 15 }
  0xf6   : > { %2634 = vmatpush3.bf16.msra.mxu0 %v2633_v28  ;;  %v3693_v52 = vld [vmem:[%s619_s21 + $0x8] sm:$0xff]  ;;  %776 = vmatprep.mubr.f32.mxu0 %v3691_v48  ;;  %v646_v53 = vrot.slane %v3691_v48, 1  ;;  %v667_v55 = vld [vmem:[#allocation2 + $0x50] sm:$0xff]  ;;  %v668_v56 = vld [vmem:[#allocation2 + $0x58] sm:$0xff]  ;;  %v2675_v60 = vpack.c.bf16 %v700_v51, %v699_v50  ;;  %v635_v15 = vrot.slane %v3691_v48, 7  ;;  %s612_s23 = sand.u32 1, %s4096_s15  }
  0xf7   : > { %2636 = vmatprep.subr.bf16.mxu0 %v2635_v31  ;;  %v647_v57 = vrot.slane %v3693_v52, 1  ;;  %v685_v58 = vld [vmem:[#allocation2 + $0xe0] sm:$0xff]  ;;  %v686_v59 = vld [vmem:[#allocation2 + $0xe8] sm:$0xff]  ;;  %v2645_v62 = vpack.c.bf16 %v668_v56, %v667_v55  ;;  %v687_v4 = vld [vmem:[#allocation2 + $0xf0] sm:$0xff]  ;;  %v636_v16 = vrot.slane %v3693_v52, 7  ;;  %s2116_s18 = sshll.u32 %s612_s23, 4 }
  0xf8   : > { %2666 = vmatpush3.bf16.msra.mxu1 %v2663_v27  ;;  %v701_v63 = vld [vmem:[#allocation2 + $0x160] sm:$0xff]  ;;  %v702_v0 = vld [vmem:[#allocation2 + $0x168] sm:$0xff]  ;;  %v2647_v1 = vpack.c.bf16 %v686_v59, %v685_v58  ;;  %v688_v5 = vld [vmem:[#allocation2 + $0xf8] sm:$0xff]  ;;  %s614_s21 = scalar_lea.vmem [#allocation16], %s2116_s18  ;;  %s3995_s17 = scalar_lea.sflag [#allocation4], %s612_s23 }
  0xf9   : > { %2668 = vmatprep.subr.bf16.mxu1 %v2667_v37  ;;  %v649_v61 = vsel %vm648_vm0, %v646_v53, %v647_v57  ;;  %v669_v2 = vld [vmem:[#allocation2 + $0x60] sm:$0xff]  ;;  %v670_v3 = vld [vmem:[#allocation2 + $0x68] sm:$0xff]  ;;  %v2679_v6 = vpack.c.bf16 %v702_v0, %v701_v63  ;;  %v703_v8 = vld [vmem:[#allocation2 + $0x170] sm:$0xff]  ;;  %v2651_v10 = vpack.c.bf16 %v688_v5, %v687_v4  ;;  %v639_v20 = vsel %vm637_vm1, %v636_v16, %v635_v15  ;;  %s1937_s29 = sshll.u32 %s614_s21, 4  ;;  %s3988_s29 = int_to_ptr.vmem [resolvable:$true] %s1937_s29 }
  0xfa   : > { %2638 = vmatpush3.bf16.msra.mxu0 %v2637_v38  ;;  %2390 = vmatprep.mubr.f32.mxu1 %v649_v61  ;;  %v2649_v7 = vpack.c.bf16 %v670_v3, %v669_v2  ;;  %v704_v9 = vld [vmem:[#allocation2 + $0x178] sm:$0xff]  ;;  %v671_v11 = vld [vmem:[#allocation2 + $0x70] sm:$0xff]  ;;  %v880_v17 = vld [vmem:[%s4049_s13] sm:$0xff]  ;;  %v650_v25 = vsel %vm648_vm0, %v647_v57, %v646_v53  ;;  %v638_v26 = vsel %vm637_vm1, %v635_v15, %v636_v16  ;;  %p3257_p0 = scmp.lt.s32.totalorder %s3988_s29, %s3255_s5 }
  0xfb   : > { %2640 = vmatprep.subr.bf16.mxu0 %v2639_v41  ;;  %v672_v12 = vld [vmem:[#allocation2 + $0x78] sm:$0xff]  ;;  %v2683_v13 = vpack.c.bf16 %v704_v9, %v703_v8  ;;  %v881_v18 = vld [vmem:[%s4049_s13 + $0x8] sm:$0xff]  ;;  %v882_v23 = vld [vmem:[%s4049_s13 + $0x10] sm:$0xff] }
  0xfc   : > { %2670 = vmatpush3.bf16.msra.mxu1 %v2667_v37  ;;  %v2653_v14 = vpack.c.bf16 %v672_v12, %v671_v11  ;;  %v3716_v21 = vpack.c.bf16 %v881_v18, %v880_v17  ;;  %v883_v24 = vld [vmem:[%s4049_s13 + $0x18] sm:$0xff]  ;;  %v884_v28 = vld [vmem:[%s4049_s13 + $0x20] sm:$0xff]  ;;  %v885_v29 = vld [vmem:[%s4049_s13 + $0x28] sm:$0xff] }
  0xfd   : > { %2672 = vmatprep.subr.bf16.mxu1 %v2671_v47  ;;  %v3735_v27 = vpack.c.bf16 %v883_v24, %v882_v23  ;;  %v3752_v30 = vpack.c.bf16 %v885_v29, %v884_v28  ;;  %v886_v31 = vld [vmem:[%s4049_s13 + $0x30] sm:$0xff]  ;;  %v887_v32 = vld [vmem:[%s4049_s13 + $0x38] sm:$0xff]  ;;  %v888_v34 = vld [vmem:[%s4049_s13 + $0x40] sm:$0xff] }
  0xfe   : > { %2642 = vmatpush3.bf16.msra.mxu0 %v2641_v49  ;;  %v3764_v33 = vpack.c.bf16 %v887_v32, %v886_v31  ;;  %v889_v35 = vld [vmem:[%s4049_s13 + $0x48] sm:$0xff]  ;;  %v890_v37 = vld [vmem:[%s4049_s13 + $0x50] sm:$0xff]  ;;  %v891_v38 = vld [vmem:[%s4049_s13 + $0x58] sm:$0xff] }
  0xff   : > { %2644 = vmatprep.subr.bf16.mxu0 %v2643_v54  ;;  %v3776_v36 = vpack.c.bf16 %v889_v35, %v888_v34  ;;  %v3788_v39 = vpack.c.bf16 %v891_v38, %v890_v37  ;;  %v892_v40 = vld [vmem:[%s4049_s13 + $0x60] sm:$0xff]  ;;  %v893_v41 = vld [vmem:[%s4049_s13 + $0x68] sm:$0xff]  ;;  %v894_v43 = vld [vmem:[%s4049_s13 + $0x70] sm:$0xff] }
 0x100   : > { %2674 = vmatpush3.bf16.msra.mxu1 %v2671_v47  ;;  %v3800_v42 = vpack.c.bf16 %v893_v41, %v892_v40  ;;  %v895_v44 = vld [vmem:[%s4049_s13 + $0x78] sm:$0xff]  ;;  %v3346_v47 = vmov 0.0   ;;  %v2119_v51 = vld [vmem:[%s4040_s4] ss:$0 sm:$0xff]  ;;  %v1280_v31 = vld [vmem:[#allocation8 + $0x80] sm:$0xff] }
 0x101   : > { %2676 = vmatprep.subr.bf16.mxu1 %v2675_v60  ;;  %v3812_v45 = vpack.c.bf16 %v895_v44, %v894_v43  ;;  %v3839_v15 = vld [vmem:[%s4050_s14] sm:$0xff]  ;;  %v1281_v32 = vld [vmem:[#allocation8 + $0x88] sm:$0xff]  ;;  %v1282_v44 = vld [vmem:[#allocation8 + $0x90] sm:$0xff] }
 0x102   : > { %2646 = vmatpush3.bf16.msra.mxu0 %v2645_v62  ;;  %v1264_v34 = vld [vmem:[#allocation8] sm:$0xff]  ;;  %v2735_v35 = vpack.c.bf16 %v1281_v32, %v1280_v31  ;;  %v1265_v37 = vld [vmem:[#allocation8 + $0x8] sm:$0xff]  ;;  %v1307_v31 = vld [vmem:[#allocation8 + $0x158] sm:$0xff] }
 0x103   : > { %2648 = vmatprep.subr.bf16.mxu0 %v2647_v1  ;;  %v1296_v38 = vld [vmem:[#allocation8 + $0x100] sm:$0xff]  ;;  %v1297_v40 = vld [vmem:[#allocation8 + $0x108] sm:$0xff]  ;;  %v2737_v41 = vpack.c.bf16 %v1265_v37, %v1264_v34  ;;  %v1275_v37 = vld [vmem:[#allocation8 + $0x58] sm:$0xff] }
 0x104   : > { %2678 = vmatpush3.bf16.msra.mxu1 %v2675_v60  ;;  %v2767_v43 = vpack.c.bf16 %v1297_v40, %v1296_v38  ;;  %v1292_v40 = vld [vmem:[#allocation8 + $0xe0] sm:$0xff] }
 0x105   : > { %2680 = vmatprep.subr.bf16.mxu1 %v2679_v6 }
 0x106   : > { %2650 = vmatpush3.bf16.msra.mxu0 %v2649_v7 }
 0x107   : > { %2652 = vmatprep.subr.bf16.mxu0 %v2651_v10 }
 0x108   : > { %2682 = vmatpush3.bf16.msra.mxu1 %v2679_v6 }
 0x109   : > { %2684 = vmatprep.subr.bf16.mxu1 %v2683_v13 }
 0x10a   : > { %2654 = vmatpush3.bf16.msra.mxu0 %v2653_v14 }
 0x10b   : > { %2687 = vmatprep.subr.bf16.mxu0 %v3344_v22 }
 0x10c   : > { %2686 = vmatpush3.bf16.msra.mxu1 %v2683_v13 }
 0x10d   : > { %2121 = vmatmul.mubr.msk.f32.vlgmr.msra.gmra.mrb[0].mxu0 %vm2150_vm2, %v639_v20  ;;  %2711 = vmatprep.subr.bf16.mxu1 %v3344_v22 }
 0x10e   : > { %781 = vmatprep.mubr.f32.mxu0 %v3693_v52  ;;  %2689 = vmatpush3.bf16.msra.mxu0 %v3716_v21 }
 0x10f   : > { %2391 = vmatmul.mubr.msk.f32.vlgmr.msra.gmra.mrb[0].mxu1 %vm2151_vm3, %v650_v25  ;;  %2690 = vmatprep.subr.bf16.mxu0 %v3344_v22 }
 0x110   : > { %2713 = vmatpush3.bf16.msra.mxu1 %v3716_v21  ;;  %2460 = vmatprep.mubr.msk.f32.mxu1 %vm3345_vm4, %v3346_v47 }
 0x111   : > { %782 = vmatmul.mubr.f32.gmra.mrb[2].mxu0 %v638_v26  ;;  %2714 = vmatprep.subr.bf16.mxu1 %v3344_v22 }
 0x112   : > { %2692 = vmatpush3.bf16.msra.mxu0 %v3735_v27  ;;  %2425 = vmatprep.mubr.msk.f32.mxu0 %vm3345_vm4, %v3346_v47 }
 0x113   : > { %2693 = vmatprep.subr.bf16.mxu0 %v3344_v22 }
 0x114   : > { %2716 = vmatpush3.bf16.msra.mxu1 %v3735_v27 }
 0x115   : > { %2717 = vmatprep.subr.bf16.mxu1 %v3344_v22 }
 0x116   : > { %2695 = vmatpush3.bf16.msra.mxu0 %v3752_v30 }
 0x117   : > { %2696 = vmatprep.subr.bf16.mxu0 %v3344_v22 }
 0x118   : > { %2719 = vmatpush3.bf16.msra.mxu1 %v3752_v30 }
 0x119   : > { %2720 = vmatprep.subr.bf16.mxu1 %v3344_v22 }
 0x11a   : > { %2698 = vmatpush3.bf16.msra.mxu0 %v3764_v33 }
 0x11b   : > { %2699 = vmatprep.subr.bf16.mxu0 %v3344_v22 }
 0x11c   : > { %2722 = vmatpush3.bf16.msra.mxu1 %v3764_v33 }
 0x11d   : > { %2723 = vmatprep.subr.bf16.mxu1 %v3344_v22 }
 0x11e   : > { %2701 = vmatpush3.bf16.msra.mxu0 %v3776_v36 }
 0x11f   : > { %2702 = vmatprep.subr.bf16.mxu0 %v3344_v22 }
 0x120   : > { %2725 = vmatpush3.bf16.msra.mxu1 %v3776_v36 }
 0x121   : > { %2726 = vmatprep.subr.bf16.mxu1 %v3344_v22 }
 0x122   : > { %2704 = vmatpush3.bf16.msra.mxu0 %v3788_v39 }
 0x123   : > { %2705 = vmatprep.subr.bf16.mxu0 %v3344_v22 }
 0x124   : > { %2728 = vmatpush3.bf16.msra.mxu1 %v3788_v39 }
 0x125   : > { %2729 = vmatprep.subr.bf16.mxu1 %v3344_v22 }
 0x126   : > { %2707 = vmatpush3.bf16.msra.mxu0 %v3800_v42 }
 0x127   : > { %2708 = vmatprep.subr.bf16.mxu0 %v3344_v22 }
 0x128   : > { %2731 = vmatpush3.bf16.msra.mxu1 %v3800_v42 }
 0x129   : > { %2732 = vmatprep.subr.bf16.mxu1 %v3344_v22 }
 0x12a   : > { %2710 = vmatpush3.bf16.msra.mxu0 %v3812_v45 }
 0x12b   : > { %2736 = vmatprep.subr.bf16.mxu0 %v2735_v35  ;;  %v1274_v35 = vld [vmem:[#allocation8 + $0x50] sm:$0xff] }
 0x12c   : > { %2734 = vmatpush3.bf16.msra.mxu1 %v3812_v45 }
 0x12d   : > { %2463 = vmatprep.subr.mxu1 %v3346_v47 }
 0x1e0   : > { %v2184_v49 = vpop.f32.mrb[0].mxu0 }
 0x1e1   : > { %v2185_v50 = vpop.f32.mrb[1].mxu0 }
 0x1e2   : > { %v2186_v53 = vadd.f32 %v2185_v50, %v2184_v49  ;;  %v2392_v54 = vpop.f32.mrb[0].mxu1  ;;  %v1283_v49 = vld [vmem:[#allocation8 + $0x98] sm:$0xff]  ;;  %v1266_v50 = vld [vmem:[#allocation8 + $0x10] sm:$0xff] }
 0x1e3   : > { %v853_v55 = vpop.f32.mrb[1].mxu1 }
 0x1e4   : > { %v2187_v56 = vpop.f32.mrb[2].mxu0  ;;  %v779_v57 = vadd.f32 %v2186_v53, %v2119_v51  ;;  %v1267_v53 = vld [vmem:[#allocation8 + $0x18] sm:$0xff] }
 0x1e5   : > { %v2188_v58 = vpop.f32.mrb[3].mxu0 }
 0x1e6   : > { %v2189_v59 = vadd.f32 %v2188_v58, %v2187_v56  ;;  %v3824_v60 = vadd.f32 %v853_v55, %v779_v57  ;;  %v1299_v55 = vld [vmem:[#allocation8 + $0x118] sm:$0xff]  ;;  %v2741_v56 = vpack.c.bf16 %v1267_v53, %v1266_v50  ;;  %v1284_v58 = vld [vmem:[#allocation8 + $0xa0] sm:$0xff]  ;;  %v1277_v53 = vld [vmem:[#allocation8 + $0x68] sm:$0xff] }
 0x1e8   : > { %v784_v61 = vadd.f32 %v2189_v59, %v2119_v51  ;;  %v871_v0 = vmul.f32 %v3824_v60, %v3824_v60  ;;  %v2739_v51 = vpack.c.bf16 %v1283_v49, %v1282_v44  ;;  %v1285_v59 = vld [vmem:[#allocation8 + $0xa8] sm:$0xff]  ;;  %v2757_v49 = vpack.c.bf16 %v1275_v37, %v1274_v35 }
 0x1e9   : > { %v1309_v44 = vld [vmem:[#allocation8 + $0x168] sm:$0xff] }
 0x1ea   : > { %v3826_v62 = vadd.f32 %v2392_v54, %v784_v61  ;;  %v1298_v54 = vld [vmem:[#allocation8 + $0x110] sm:$0xff]  ;;  %v1268_v61 = vld [vmem:[#allocation8 + $0x20] sm:$0xff] }
 0x1eb   : > { %v2771_v57 = vpack.c.bf16 %v1299_v55, %v1298_v54  ;;  %v1294_v55 = vld [vmem:[#allocation8 + $0xf0] sm:$0xff] }
 0x1ec   : > { %v864_v63 = vadd.f32 %v3826_v62, %v3824_v60  ;;  %v872_v1 = vmul.f32 %v3826_v62, %v3826_v62 }
 0x1ee   : > { %v865_v2 = vrot.slane %v864_v63, 4  ;;  %v873_v3 = vadd.f32 %v872_v1, %v871_v0  ;;  %v1269_v0 = vld [vmem:[#allocation8 + $0x28] sm:$0xff]  ;;  %v1300_v1 = vld [vmem:[#allocation8 + $0x120] sm:$0xff] }
 0x1f0   : > { %v866_v4 = vadd.f32 %v865_v2, %v864_v63  ;;  %v874_v5 = vrot.slane %v873_v3, 4  ;;  %v2743_v63 = vpack.c.bf16 %v1285_v59, %v1284_v58  ;;  %v1301_v2 = vld [vmem:[#allocation8 + $0x128] sm:$0xff]  ;;  %v1278_v59 = vld [vmem:[#allocation8 + $0x70] sm:$0xff] }
 0x1f2   : > { %v867_v6 = vrot.slane %v866_v4, 2  ;;  %v875_v7 = vadd.f32 %v874_v5, %v873_v3  ;;  %v2775_v3 = vpack.c.bf16 %v1301_v2, %v1300_v1  ;;  %v1287_v5 = vld [vmem:[#allocation8 + $0xb8] sm:$0xff] }
 0x1f3   : > { %v1311_v1 = vld [vmem:[#allocation8 + $0x178] sm:$0xff] }
 0x1f4   : > { %v868_v8 = vadd.f32 %v867_v6, %v866_v4  ;;  %v876_v9 = vrot.slane %v875_v7, 2  ;;  %v1286_v4 = vld [vmem:[#allocation8 + $0xb0] sm:$0xff] }
 0x1f5   : > { %v1302_v6 = vld [vmem:[#allocation8 + $0x130] sm:$0xff] }
 0x1f6   : > { %v869_v10 = vrot.slane %v868_v8, 1  ;;  %v877_v11 = vadd.f32 %v876_v9, %v875_v7  ;;  %v1303_v7 = vld [vmem:[#allocation8 + $0x138] sm:$0xff]  ;;  %v2747_v9 = vpack.c.bf16 %v1287_v5, %v1286_v4  ;;  %v3851_v5 = vsub.s32 0, %v3689_v46 }
 0x1f8   : > { %v870_v12 = vadd.f32 %v869_v10, %v868_v8  ;;  %v878_v13 = vrot.slane %v877_v11, 1  ;;  %v2745_v8 = vpack.c.bf16 %v1269_v0, %v1268_v61  ;;  %v1270_v10 = vld [vmem:[#allocation8 + $0x30] sm:$0xff]  ;;  %v1279_v61 = vld [vmem:[#allocation8 + $0x78] sm:$0xff] }
 0x1f9   : > { %v1310_v0 = vld [vmem:[#allocation8 + $0x170] sm:$0xff] }
 0x1fa   : > { %2426 = vmatmul.mubr.f32.vlgmr.msra.gmra.mrb[4].mxu0 %v870_v12  ;;  %v879_v14 = vadd.f32 %v878_v13, %v877_v11  ;;  %v1271_v11 = vld [vmem:[#allocation8 + $0x38] sm:$0xff]  ;;  %v2779_v12 = vpack.c.bf16 %v1303_v7, %v1302_v6  ;;  %v1288_v13 = vld [vmem:[#allocation8 + $0xc0] sm:$0xff]  ;;  %v2795_v2 = vpack.c.bf16 %v1311_v1, %v1310_v0 }
 0x1fb   : > { %2738 = vmatpush3.bf16.msra.mxu0 %v2737_v41  ;;  %v1293_v41 = vld [vmem:[#allocation8 + $0xe8] sm:$0xff]  ;;  %v1219_v7 = vld [vmem:[%s622_s27] sm:$0x1]  ;;  %s3250_s27 = scalar_lea.vmem %s3988_s29, 256 }
 0x1fc   : > { %2461 = vmatmul.mubr.f32.vlgmr.msra.gmra.mrb[2].mxu1 %v879_v14  ;;  %2740 = vmatprep.subr.bf16.mxu0 %v2739_v51  ;;  %v1289_v14 = vld [vmem:[#allocation8 + $0xc8] sm:$0xff]  ;;  %v2759_v50 = vpack.c.bf16 %v1293_v41, %v1292_v40  ;;  %v1276_v51 = vld [vmem:[#allocation8 + $0x60] sm:$0xff]  ;;  %p3251_p8 = scmp.ne.s32.totalorder %s3988_s29, %s3250_s27  ;;  %p3258_p6 = scmp.lt.s32.totalorder %s3256_s19, %s3250_s27 }
 0x1fd   : > { %2465 = vmatprep.mubr.msk.f32.mxu1 %vm3345_vm4, %v3346_v47  ;;  %2464 = vmatpush3.msra.mxu1 %v3839_v15 }
 0x1fe   : > { %2468 = vmatprep.subr.mxu1 %v3346_v47  ;;  %p3252_p13 = pnand %p3251_p8, %p4099_p11  ;;  %p3259_p5 = por %p3258_p6, %p3257_p0 }
 0x1ff   : > { %2742 = vmatpush3.bf16.msra.mxu0 %v2741_v56  ;;  %v1295_v56 = vld [vmem:[#allocation8 + $0xf8] sm:$0xff] }
 0x200   : > { %2744 = vmatprep.subr.bf16.mxu0 %v2743_v63  ;;  %v2763_v58 = vpack.c.bf16 %v1295_v56, %v1294_v55  ;;  %v2765_v63 = vpack.c.bf16 %v1279_v61, %v1278_v59  ;;  %p3253_p1 = pneg %p3252_p13 }
 0x202   : > { %p3260_p9 = pnand %p3259_p5, %p3253_p1 }
 0x203   : > { %2746 = vmatpush3.bf16.msra.mxu0 %v2745_v8 }
 0x204   : > { %2748 = vmatprep.subr.bf16.mxu0 %v2747_v9 }
 0x2cd   : > { %v962_v16 = vpop.f32.mrb[4].mxu0 }
 0x2ce   : > { %v967_v17 = vmul.f32 0.03125, %v962_v16  ;;  %v2427_v18 = vpop.f32.mrb[5].mxu0  ;;  %v1304_v16 = vld [vmem:[#allocation8 + $0x140] sm:$0xff] }
 0x2cf   : > { %v1034_v20 = vpop.f32.mrb[2].mxu1  ;;  %v2749_v18 = vpack.c.bf16 %v1271_v11, %v1270_v10 }
 0x2d0   : > { %v1039_v23 = vmul.f32 %v967_v17, %v967_v17  ;;  %v1038_v24 = vmul.f32 0.03125, %v1034_v20  ;;  %v2462_v25 = vpop.f32.mrb[3].mxu1  ;;  %2466 = vmatmul.mubr.msk.f32.vlgmr.msra.gmra.mrb[4].mxu1 %vm1044_vm5, %v967_v17  ;;  %v1305_v17 = vld [vmem:[#allocation8 + $0x148] sm:$0xff]  ;;  %v2751_v20 = vpack.c.bf16 %v1289_v14, %v1288_v13  ;;  %v2126_v14 = vld [vmem:[#allocation5] ss:$0 sm:$0xff] }
 0x2d1   : > { %2469 = vmatpush3.msra.mxu1 %v3839_v15  ;;  %2470 = vmatprep.mubr.msk.f32.mxu1 %vm3345_vm4, %v3346_v47  ;;  %v2783_v25 = vpack.c.bf16 %v1305_v17, %v1304_v16 }
 0x2d2   : > { %v1040_v26 = vsub.f32 %v1038_v24, %v1039_v23  ;;  %2768 = vmatprep.subr.bf16.mxu1 %v2767_v43  ;;  %v1272_v23 = vld [vmem:[#allocation8 + $0x40] sm:$0xff]  ;;  %v1273_v24 = vld [vmem:[#allocation8 + $0x48] sm:$0xff]  ;;  %2750 = vmatpush3.bf16.msra.mxu0 %v2749_v18  ;;  %v2127_v18 = vld [vmem:[#allocation7] ss:$0 sm:$0xff] }
 0x2d3   : > { %v2753_v32 = vpack.c.bf16 %v1273_v24, %v1272_v23  ;;  %2752 = vmatprep.subr.bf16.mxu0 %v2751_v20 }
 0x2d4   : > { %v1041_v28 = vadd.f32 1e-05, %v1040_v26  ;;  %v1290_v26 = vld [vmem:[#allocation8 + $0xd0] sm:$0xff] }
 0x2d6   : > { %3006 = vrsqrt.f32 %v1041_v28  ;;  %v1291_v28 = vld [vmem:[#allocation8 + $0xd8] sm:$0xff]  ;;  %2754 = vmatpush3.bf16.msra.mxu0 %v2753_v32 }
 0x2d7   : > { %v2755_v34 = vpack.c.bf16 %v1291_v28, %v1290_v26  ;;  %v2128_v26 = vld [vmem:[%s625_s30] ss:$0 sm:$0xff] }
 0x2d9   : > { %2756 = vmatprep.subr.bf16.mxu0 %v2755_v34 }
 0x2da   : > { %2758 = vmatpush3.bf16.msra.mxu0 %v2757_v49 }
 0x2db   : > { %2760 = vmatprep.subr.bf16.mxu0 %v2759_v50 }
 0x2e0   : > { %v3007_v29 = vpop.eup %3006 }
 0x2e1   : > { %2471 = vmatmul.mubr.msk.f32.vlgmr.msra.gmra.mrb[6].mxu1 %vm1044_vm5, %v3007_v29  ;;  %v1306_v29 = vld [vmem:[#allocation8 + $0x150] sm:$0xff] }
 0x2e2   : > { %2770 = vmatpush3.bf16.msra.mxu1 %v2767_v43  ;;  %v2787_v38 = vpack.c.bf16 %v1307_v31, %v1306_v29  ;;  %v1308_v43 = vld [vmem:[#allocation8 + $0x160] sm:$0xff] }
 0x2e3   : > { %2772 = vmatprep.subr.bf16.mxu1 %v2771_v57  ;;  %v2791_v54 = vpack.c.bf16 %v1309_v44, %v1308_v43 }
 0x2e6   : > { %2774 = vmatpush3.bf16.msra.mxu1 %v2771_v57  ;;  %v2761_v57 = vpack.c.bf16 %v1277_v53, %v1276_v51 }
 0x2e7   : > { %2776 = vmatprep.subr.bf16.mxu1 %v2775_v3 }
 0x2e8   : > { %2762 = vmatpush3.bf16.msra.mxu0 %v2761_v57 }
 0x2e9   : > { %2764 = vmatprep.subr.bf16.mxu0 %v2763_v58 }
 0x2ea   : > { %2778 = vmatpush3.bf16.msra.mxu1 %v2775_v3 }
 0x2eb   : > { %2780 = vmatprep.subr.bf16.mxu1 %v2779_v12 }
 0x2ec   : > { %2766 = vmatpush3.bf16.msra.mxu0 %v2765_v63 }
 0x2ed   : > { %2799 = vmatprep.subr.bf16.mxu0 %v3344_v22 }
 0x2ee   : > { %2782 = vmatpush3.bf16.msra.mxu1 %v2779_v12  ;;  %v1220_v12 = vadd.f32 1.0, %v1219_v7 }
 0x2ef   : > { %2784 = vmatprep.subr.bf16.mxu1 %v2783_v25 }
 0x2f0   : > { %v1225_v24 = vrot.slane %v1220_v12, %v3851_v5 }
 0x2f2   : > { %2786 = vmatpush3.bf16.msra.mxu1 %v2783_v25 }
 0x2f3   : > { %2788 = vmatprep.subr.bf16.mxu1 %v2787_v38 }
 0x2f6   : > { %2790 = vmatpush3.bf16.msra.mxu1 %v2787_v38 }
 0x2f7   : > { %2792 = vmatprep.subr.bf16.mxu1 %v2791_v54 }
 0x2fa   : > { %2794 = vmatpush3.bf16.msra.mxu1 %v2791_v54 }
 0x2fb   : > { %2796 = vmatprep.subr.bf16.mxu1 %v2795_v2 }
 0x2fe   : > { %2798 = vmatpush3.bf16.msra.mxu1 %v2795_v2 }
 0x2ff   : > { %2823 = vmatprep.subr.bf16.mxu1 %v3344_v22 }
 0x3a3   : > { %v1114_v3 = vpop.f32.mrb[4].mxu1 }
 0x3a4   : > { %v2467_v4 = vpop.f32.mrb[5].mxu1  ;;  %v1194_v6 = vrot.slane %v1114_v3, %v3851_v5 }
 0x3a6   : > { %v1195_v9 = vsub.f32 %v3824_v60, %v1194_v6  ;;  %v1196_v10 = vsub.f32 %v3826_v62, %v1194_v6 }
 0x3b4   : > { %v1187_v8 = vpop.f32.mrb[6].mxu1 }
 0x3b5   : > { %v1200_v11 = vrot.slane %v1187_v8, %v3851_v5  ;;  %v2472_v13 = vpop.f32.mrb[7].mxu1 }
 0x3b7   : > { %v1201_v16 = vmul.f32 %v1200_v11, %v1195_v9  ;;  %v1202_v17 = vmul.f32 %v1200_v11, %v1196_v10 }
 0x3b9   : > { %v1209_v20 = vmul.f32 %v2126_v14, %v1201_v16  ;;  %v1210_v23 = vmul.f32 %v2126_v14, %v1202_v17  ;;  %v1821_v17 = vld [vmem:[%s4047_s11] sm:$0xff] }
 0x3bb   : > { %v1217_v25 = vadd.f32 %v2127_v18, %v1209_v20  ;;  %v1218_v60 = vadd.f32 %v2127_v18, %v1210_v23  ;;  %v1822_v18 = vld [vmem:[%s4047_s11 + $0x8] sm:$0xff]  ;;  %v1824_v23 = vld [vmem:[%s4047_s11 + $0x18] sm:$0xff] }
 0x3bc   : > { %v2847_v20 = vpack.c.bf16 %v1822_v18, %v1821_v17 }
 0x3bd   : > { %v1228_v62 = vmul.f32 %v1225_v24, %v1218_v60  ;;  %v1227_v28 = vmul.f32 %v1225_v24, %v1217_v25  ;;  %v1825_v24 = vld [vmem:[%s4047_s11 + $0x20] sm:$0xff]  ;;  %v1826_v60 = vld [vmem:[%s4047_s11 + $0x28] sm:$0xff] }
 0x3bf   : > { %v1236_v29 = vadd.f32 %v2128_v26, %v1227_v28  ;;  %v1237_v31 = vadd.f32 %v2128_v26, %v1228_v62  ;;  %v2855_v26 = vpack.c.bf16 %v1826_v60, %v1825_v24  ;;  %v1827_v62 = vld [vmem:[%s4047_s11 + $0x30] sm:$0xff]  ;;  %v1828_v28 = vld [vmem:[%s4047_s11 + $0x38] sm:$0xff] }
 0x3c1   : > { %v2129_v32 = vmul.f32 -1.442695, %v1236_v29  ;;  %v2130_v34 = vmul.f32 -1.442695, %v1237_v31 }
 0x3c3   : > { %3008 = vpow2.f32 %v2129_v32  ;;  %v1830_v32 = vld [vmem:[%s4047_s11 + $0x48] sm:$0xff] }
 0x3c4   : > { %3010 = vpow2.f32 %v2130_v34 }
 0x3cd   : > { %v3009_v35 = vpop.eup %3008 }
 0x3ce   : > { %v3011_v37 = vpop.eup %3010  ;;  %v1244_v38 = vadd.f32 1.0, %v3009_v35  ;;  %v1831_v35 = vld [vmem:[%s4047_s11 + $0x50] sm:$0xff] }
 0x3cf   : > { %v1245_v40 = vadd.f32 1.0, %v3011_v37  ;;  %v1832_v37 = vld [vmem:[%s4047_s11 + $0x58] sm:$0xff] }
 0x3d0   : > { %3012 = vrcp.f32 %v1244_v38  ;;  %v2867_v38 = vpack.c.bf16 %v1832_v37, %v1831_v35 }
 0x3d1   : > { %3014 = vrcp.f32 %v1245_v40  ;;  %v1833_v40 = vld [vmem:[%s4047_s11 + $0x60] sm:$0xff] }
 0x3da   : > { %v3013_v41 = vpop.eup %3012 }
 0x3db   : > { %v3015_v43 = vpop.eup %3014  ;;  %v1250_v44 = vmul.f32 %v3013_v41, %v1236_v29  ;;  %v2859_v29 = vpack.c.bf16 %v1828_v28, %v1827_v62  ;;  %v1834_v41 = vld [vmem:[%s4047_s11 + $0x68] sm:$0xff] }
 0x3dc   : > { %v1251_v49 = vmul.f32 %v3015_v43, %v1237_v31  ;;  %v1829_v31 = vld [vmem:[%s4047_s11 + $0x40] sm:$0xff]  ;;  %v2871_v43 = vpack.c.bf16 %v1834_v41, %v1833_v40 }
 0x3dd   : > { %v1252_v50 = vrot.slane %v1250_v44, 7  ;;  %1383 = vmatprep.mubr.f32.mxu0 %v1250_v44  ;;  %v1258_v51 = vrot.slane %v1250_v44, 1  ;;  %v2863_v34 = vpack.c.bf16 %v1830_v32, %v1829_v31  ;;  %v1835_v44 = vld [vmem:[%s4047_s11 + $0x70] sm:$0xff] }
 0x3de   : > { %v1253_v53 = vrot.slane %v1251_v49, 7  ;;  %v1259_v54 = vrot.slane %v1251_v49, 1 }
 0x3e0   : > { %v1255_v55 = vsel %vm637_vm1, %v1253_v53, %v1252_v50  ;;  %v1260_v56 = vsel %vm648_vm0, %v1258_v51, %v1259_v54  ;;  %v1261_v57 = vsel %vm648_vm0, %v1259_v54, %v1258_v51  ;;  %v1254_v58 = vsel %vm637_vm1, %v1252_v50, %v1253_v53 }
 0x3e1   : > { %2133 = vmatmul.mubr.msk.f32.vlgmr.msra.gmra.mrb[6].mxu0 %vm2150_vm2, %v1255_v55  ;;  %2505 = vmatprep.mubr.f32.mxu1 %v1260_v56 }
 0x3e2   : > { %1388 = vmatprep.mubr.f32.mxu0 %v1251_v49  ;;  %2506 = vmatmul.mubr.msk.f32.vlgmr.msra.gmra.mrb[8].mxu1 %vm2151_vm3, %v1261_v57  ;;  %v1836_v49 = vld [vmem:[%s4047_s11 + $0x78] sm:$0xff] }
 0x3e3   : > { %2801 = vmatpush3.bf16.msra.mxu0 %v3716_v21  ;;  %2825 = vmatpush3.bf16.msra.mxu1 %v3716_v21  ;;  %v2875_v50 = vpack.c.bf16 %v1836_v49, %v1835_v44 }
 0x3e4   : > { %2802 = vmatprep.subr.bf16.mxu0 %v3344_v22  ;;  %2826 = vmatprep.subr.bf16.mxu1 %v3344_v22 }
 0x3e5   : > { %1389 = vmatmul.mubr.f32.gmra.mrb[8].mxu0 %v1254_v58  ;;  %2575 = vmatprep.mubr.msk.f32.mxu1 %vm3345_vm4, %v3346_v47 }
 0x3e6   : > { %2540 = vmatprep.mubr.msk.f32.mxu0 %vm3345_vm4, %v3346_v47 }
 0x3e7   : > { %2804 = vmatpush3.bf16.msra.mxu0 %v3735_v27  ;;  %2828 = vmatpush3.bf16.msra.mxu1 %v3735_v27  ;;  %v2131_v27 = vld [vmem:[#allocation10] ss:$0 sm:$0xff] }
 0x3e8   : > { %2805 = vmatprep.subr.bf16.mxu0 %v3344_v22  ;;  %2829 = vmatprep.subr.bf16.mxu1 %v3344_v22 }
 0x3eb   : > { %2807 = vmatpush3.bf16.msra.mxu0 %v3752_v30  ;;  %2831 = vmatpush3.bf16.msra.mxu1 %v3752_v30 }
 0x3ec   : > { %2808 = vmatprep.subr.bf16.mxu0 %v3344_v22  ;;  %2832 = vmatprep.subr.bf16.mxu1 %v3344_v22 }
 0x3ef   : > { %2810 = vmatpush3.bf16.msra.mxu0 %v3764_v33  ;;  %2834 = vmatpush3.bf16.msra.mxu1 %v3764_v33 }
 0x3f0   : > { %2811 = vmatprep.subr.bf16.mxu0 %v3344_v22  ;;  %2835 = vmatprep.subr.bf16.mxu1 %v3344_v22 }
 0x3f3   : > { %2813 = vmatpush3.bf16.msra.mxu0 %v3776_v36  ;;  %2837 = vmatpush3.bf16.msra.mxu1 %v3776_v36 }
 0x3f4   : > { %2814 = vmatprep.subr.bf16.mxu0 %v3344_v22  ;;  %2838 = vmatprep.subr.bf16.mxu1 %v3344_v22 }
 0x3f7   : > { %2816 = vmatpush3.bf16.msra.mxu0 %v3788_v39  ;;  %2840 = vmatpush3.bf16.msra.mxu1 %v3788_v39 }
 0x3f8   : > { %2817 = vmatprep.subr.bf16.mxu0 %v3344_v22  ;;  %2841 = vmatprep.subr.bf16.mxu1 %v3344_v22 }
 0x3fb   : > { %2819 = vmatpush3.bf16.msra.mxu0 %v3800_v42  ;;  %2843 = vmatpush3.bf16.msra.mxu1 %v3800_v42 }
 0x3fc   : > { %2820 = vmatprep.subr.bf16.mxu0 %v3344_v22  ;;  %2844 = vmatprep.subr.bf16.mxu1 %v3344_v22 }
 0x3ff   : > { %2822 = vmatpush3.bf16.msra.mxu0 %v3812_v45  ;;  %2846 = vmatpush3.bf16.msra.mxu1 %v3812_v45 }
 0x400   : > { %2578 = vmatprep.subr.mxu1 %v3346_v47  ;;  %2848 = vmatprep.subr.bf16.mxu0 %v2847_v20 }
 0x4b4   : > { %v2278_v46 = vpop.f32.mrb[6].mxu0 }
 0x4b5   : > { %v2279_v19 = vpop.f32.mrb[7].mxu0  ;;  %v2507_v21 = vpop.f32.mrb[8].mxu1 }
 0x4b6   : > { %v2280_v30 = vadd.f32 %v2279_v19, %v2278_v46  ;;  %v1460_v33 = vpop.f32.mrb[9].mxu1 }
 0x4b8   : > { %v1386_v36 = vadd.f32 %v2280_v30, %v2131_v27  ;;  %v2281_v39 = vpop.f32.mrb[8].mxu0 }
 0x4b9   : > { %v2282_v59 = vpop.f32.mrb[9].mxu0 }
 0x4ba   : > { %v3913_v42 = vadd.f32 %v1460_v33, %v1386_v36  ;;  %v2283_v61 = vadd.f32 %v2282_v59, %v2281_v39 }
 0x4bc   : > { %v1391_v63 = vadd.f32 %v2283_v61, %v2131_v27  ;;  %v1478_v45 = vmul.f32 %v3913_v42, %v3913_v42 }
 0x4be   : > { %v3915_v22 = vadd.f32 %v2507_v21, %v1391_v63  ;;  %v2138_v63 = vld [vmem:[#allocation11] ss:$0 sm:$0xff] }
 0x4c0   : > { %v1471_v0 = vadd.f32 %v3915_v22, %v3913_v42  ;;  %v1479_v1 = vmul.f32 %v3915_v22, %v3915_v22 }
 0x4c2   : > { %v1472_v2 = vrot.slane %v1471_v0, 4  ;;  %v1480_v3 = vadd.f32 %v1479_v1, %v1478_v45  ;;  %v2139_v1 = vld [vmem:[#allocation13] ss:$0 sm:$0xff] }
 0x4c4   : > { %v1473_v4 = vadd.f32 %v1472_v2, %v1471_v0  ;;  %v1481_v6 = vrot.slane %v1480_v3, 4 }
 0x4c6   : > { %v1474_v7 = vrot.slane %v1473_v4, 2  ;;  %v1482_v8 = vadd.f32 %v1481_v6, %v1480_v3 }
 0x4c8   : > { %v1475_v9 = vadd.f32 %v1474_v7, %v1473_v4  ;;  %v1483_v10 = vrot.slane %v1482_v8, 2 }
 0x4ca   : > { %v1476_v11 = vrot.slane %v1475_v9, 1  ;;  %v1484_v12 = vadd.f32 %v1483_v10, %v1482_v8 }
 0x4cc   : > { %v1477_v13 = vadd.f32 %v1476_v11, %v1475_v9  ;;  %v1485_v14 = vrot.slane %v1484_v12, 1 }
 0x4ce   : > { %2541 = vmatmul.mubr.f32.vlgmr.msra.gmra.mrb[10].mxu0 %v1477_v13  ;;  %v1486_v16 = vadd.f32 %v1485_v14, %v1484_v12 }
 0x4cf   : > { %2620 = vmatprep.mubr.f32.mxu0 %v3691_v48  ;;  %v1823_v48 = vld [vmem:[%s4047_s11 + $0x10] sm:$0xff]  ;;  %2850 = vmatpush3.bf16.msra.mxu0 %v2847_v20 }
 0x4d0   : > { %2576 = vmatmul.mubr.f32.vlgmr.msra.gmra.mrb[10].mxu1 %v1486_v16  ;;  %v2851_v25 = vpack.c.bf16 %v1824_v23, %v1823_v48 }
 0x4d1   : > { %2579 = vmatpush3.msra.mxu1 %v3839_v15  ;;  %2580 = vmatprep.mubr.msk.f32.mxu1 %vm3345_vm4, %v3346_v47 }
 0x4d2   : > { %2583 = vmatprep.subr.mxu1 %v3346_v47  ;;  %2852 = vmatprep.subr.bf16.mxu0 %v2851_v25 }
 0x4d3   : > { %2854 = vmatpush3.bf16.msra.mxu0 %v2851_v25 }
 0x4d4   : > { %2856 = vmatprep.subr.bf16.mxu0 %v2855_v26 }
 0x4d7   : > { %2858 = vmatpush3.bf16.msra.mxu0 %v2855_v26 }
 0x4d8   : > { %2860 = vmatprep.subr.bf16.mxu0 %v2859_v29 }
 0x4db   : > { %2862 = vmatpush3.bf16.msra.mxu0 %v2859_v29 }
 0x4dc   : > { %2864 = vmatprep.subr.bf16.mxu0 %v2863_v34 }
 0x4df   : > { %2866 = vmatpush3.bf16.msra.mxu0 %v2863_v34 }
 0x4e0   : > { %2868 = vmatprep.subr.bf16.mxu0 %v2867_v38 }
 0x4e3   : > { %2870 = vmatpush3.bf16.msra.mxu0 %v2867_v38 }
 0x4e4   : > { %2872 = vmatprep.subr.bf16.mxu0 %v2871_v43 }
 0x4e7   : > { %2874 = vmatpush3.bf16.msra.mxu0 %v2871_v43 }
 0x4e8   : > { %2876 = vmatprep.subr.bf16.mxu0 %v2875_v50 }
 0x4eb   : > { %2878 = vmatpush3.bf16.msra.mxu0 %v2875_v50 }
 0x4ee   : > { %2621 = vmatmul.mubr.f32.vlgmr.msra.gmra.mrb[12].mxu0 %v3693_v52 }
 0x5a1   : > { %v1553_v51 = vpop.f32.mrb[10].mxu0 }
 0x5a2   : > { %v1557_v53 = vmul.f32 0.03125, %v1553_v51  ;;  %v2542_v54 = vpop.f32.mrb[11].mxu0 }
 0x5a3   : > { %v1624_v55 = vpop.f32.mrb[10].mxu1 }
 0x5a4   : > { %v1629_v56 = vmul.f32 %v1557_v53, %v1557_v53  ;;  %v1628_v57 = vmul.f32 0.03125, %v1624_v55  ;;  %v2577_v58 = vpop.f32.mrb[11].mxu1  ;;  %2581 = vmatmul.mubr.msk.f32.vlgmr.msra.gmra.mrb[12].mxu1 %vm1044_vm5, %v1557_v53 }
 0x5a5   : > { %2584 = vmatpush3.msra.mxu1 %v3839_v15  ;;  %2585 = vmatprep.mubr.msk.f32.mxu1 %vm3345_vm4, %v3346_v47 }
 0x5a6   : > { %v1630_v46 = vsub.f32 %v1628_v57, %v1629_v56 }
 0x5a8   : > { %v1631_v19 = vadd.f32 1e-05, %v1630_v46 }
 0x5aa   : > { %3016 = vrsqrt.f32 %v1631_v19 }
 0x5b4   : > { %v3017_v21 = vpop.eup %3016 }
 0x5b5   : > { %2586 = vmatmul.mubr.msk.f32.vlgmr.msra.gmra.mrb[14].mxu1 %vm1044_vm5, %v3017_v21 }
 0x5c1   : > { %v2622_v52 = vpop.f32.mrb[12].mxu0 }
 0x5c2   : > { %v1910_v27 = vpop.f32.mrb[13].mxu0 }
 0x677   : > { %v1702_v30 = vpop.f32.mrb[12].mxu1 }
 0x678   : > { %v2582_v33 = vpop.f32.mrb[13].mxu1  ;;  %v1782_v36 = vrot.slane %v1702_v30, %v3851_v5 }
 0x67a   : > { %v1783_v59 = vsub.f32 %v3913_v42, %v1782_v36  ;;  %v1784_v15 = vsub.f32 %v3915_v22, %v1782_v36 }
 0x688   : > { %v1775_v39 = vpop.f32.mrb[14].mxu1 }
 0x689   : > { %v1788_v61 = vrot.slane %v1775_v39, %v3851_v5  ;;  %v2587_v47 = vpop.f32.mrb[15].mxu1  ;;  %v2142_v5 = vld [vmem:[#allocation14] ss:$0 sm:$0xff] }
 0x68a   : > { %v1916_v11 = vadd.f32 %v2622_v52, %v2142_v5  ;;  %v1911_v13 = vadd.f32 %v2142_v5, %v1910_v27 }
 0x68b   : > { %v1789_v45 = vmul.f32 %v1788_v61, %v1783_v59  ;;  %v1790_v0 = vmul.f32 %v1788_v61, %v1784_v15 }
 0x68d   : > { %v1797_v2 = vmul.f32 %v2138_v63, %v1789_v45  ;;  %v1798_v3 = vmul.f32 %v2138_v63, %v1790_v0 }
 0x68f   : > { %v1806_v4 = vadd.f32 %v2139_v1, %v1798_v3  ;;  %v1805_v6 = vadd.f32 %v2139_v1, %v1797_v2 }
 0x691   : > { %v2141_v7 = vmul.f32 -1.442695, %v1806_v4  ;;  %v2140_v8 = vmul.f32 -1.442695, %v1805_v6 }
 0x693   : > { %3018 = vpow2.f32 %v2141_v7 }
 0x694   : > { %3020 = vpow2.f32 %v2140_v8 }
 0x69d   : > { %v3019_v9 = vpop.eup %3018 }
 0x69e   : > { %v3021_v42 = vpop.eup %3020  ;;  %v1814_v22 = vadd.f32 1.0, %v3019_v9 }
 0x69f   : > { %v1813_v10 = vadd.f32 1.0, %v3021_v42 }
 0x6a0   : > { %3022 = vrcp.f32 %v1814_v22 }
 0x6a1   : > { %3024 = vrcp.f32 %v1813_v10 }
 0x6aa   : > { %v3023_v12 = vpop.eup %3022 }
 0x6ab   : > { %v3025_v14 = vpop.eup %3024  ;;  %v1820_v16 = vmul.f32 %v3023_v12, %v1806_v4 }
 0x6ac   : > { %v1819_v17 = vmul.f32 %v3025_v14, %v1805_v6 }
 0x6ad   : > { %v1920_v18 = vadd.f32 %v1916_v11, %v1820_v16 }
 0x6ae   : > { %v1919_v20 = vadd.f32 %v1911_v13, %v1819_v17 }
 0x6af   : > { %1922 = vst [vmem:[%s614_s21 + $0x8] sm:$0xff] %v1920_v18 }
 0x6b0   : > { %1921 = vst [vmem:[%s614_s21] sm:$0xff] %v1919_v20 }
 0x6b1   : > { %3263 = shalt.err (!%p3260_p9)
}
 0x6b2   : > { %s3264_s30 = scalar_lea.hbm %s3993_s24, 256  ;;  %s3268_s18 = scalar_lea.hbm %s4098_s16, 512 }
 0x6b3   : > { %p3265_p12 = scmp.ne.s32.totalorder %s3993_s24, %s3264_s30  ;;  %p3269_p3 = scmp.lt.u32.totalorder %s3993_s24, %s4098_s16 }
 0x6b4   : > { %p3270_p4 = scmp.lt.u32.totalorder %s3268_s18, %s3264_s30  ;;  %p3272_p8 = scmp.lt.u32.totalorder %s3264_s30, %s3993_s24 }
 0x6b5   : > { %p3266_p10 = pnand %p3265_p12, %p4099_p11 }
 0x6b6   : > { %p3271_p7 = por %p3270_p4, %p3269_p3 }
 0x6b7   : > { %p3267_p2 = pneg %p3266_p10 }
 0x6b8   : > { %p3273_p13 = por %p3272_p8, %p3271_p7 }
 0x6ba   : > { %p3274_p1 = pnand %p3273_p13, %p3267_p2 }
 0x6bc   : > { %3277 = shalt.err (!%p3274_p1)
}
 0x6bd   : > { %s3348_s28 = smov 128   ;;  %s3349_s25 = smov 8  }
 0x6be   : > { %2911 = dma.vmem_to_hbm [thread:$0]  (%p4099_p11), %s3988_s29, 256, %s3993_s24, %s3995_s17, %s3348_s28, %s3348_s28, %s3349_s25  }
 0x6bf PF: > { %s4100_s27 = sld [smem:[#allocation26_spill]]  ;;  %s4101_s22 = sld [smem:[#allocation23_spill]] }
 0x6c0   : > { %s4102_s5 = sld [smem:[#allocation30_spill]] }
 0x6c5   : > { %p2958_p0 = scmp.ge.s32.totalorder %s4100_s27, 2  ;;  %s1952_s19 = sand.u32 1, %s4101_s22  }
 0x6c6   : > { %p4103_p6 = scmp.ne.s32.totalorder %s4102_s5, 0  ;;  %s1953_s30 = scalar_lea.sflag [#allocation4], %s1952_s19 }
 0x6c8   : > { %p2939_p5 = pnand %p2958_p0, %p4103_p6 }
 0x6ca   : > { %3315 = dma.done.wait (!%p2939_p5), %s1953_s30, 256  }
 0x6cb   : > { %3317 = vsyncadd (!%p2939_p5), %s1953_s30, 4294967040  ;;  %s4104_s21 = sld [smem:[#allocation27_spill]]  ;;  %s4105_s18 = sld [smem:[#allocation24_spill]] }
 0x6cc   : > { %s4106_s19 = sld [smem:[#allocation25_spill]]  ;;  %s4107_s20 = sld [smem:[#allocation28_spill]] }
 0x6d1   : > { %p30_p9 = scmp.ge.s32.totalorder %s4104_s21, 4  }
 0x6d3   :  { %32 = sbr.rel (!%p30_p9) target bundleno = 11 (0xb), region = 154 }
 0x6da   :  { %1958 = vsyncpa [#allocation3], 1 }
 0x6db   :  { %1960 = vsyncpa [#allocation3 + $0x1], 1 }
 0x6dc   :  { %1961 = vsyncpa [#allocation6], 1 }
 0x6dd   :  { %1962 = vsyncpa [#allocation9], 1 }
 0x6de   :  { %1963 = vsyncpa [#allocation12], 1 }
 0x6df   :  { %1964 = vsyncpa [#allocation15], 1 }
 0x6e0   :  { %1965 = vsyncpa [#allocation4], 1 }
 0x6e1   :  { %1967 = vsyncpa [#allocation4 + $0x1], 1 }

</bundles_post_ra>
